<compile_context>
chip_gen: v6e
topology: v6e:2x2x1
jax: 0.10.0
libtpu: 0.0.40
codegen_flags: <defaults>
</compile_context>

<pallas_src>
import functools
import math

import jax
import jax.numpy as jnp
from jax.experimental import pallas as pl
from jax.experimental.pallas import tpu as pltpu

LANE = 128


def _round_up(x, m):
    return (x + m - 1) // m * m


# ---------------------------------------------------------------------------
# Kernel 1: per-row-tile dense transforms (hoisted out of the N^2 reduction).
#   z = H @ [W_self | W_neigh]          (single 2*f_out_p-wide matmul -> full MXU width)
#   z_self  = z[:, :f_out_p] + b        (f32, bias folded in)
#   z_neigh = z[:, f_out_p:]            (bf16, re-streamed by the aggregation matmul)
# ---------------------------------------------------------------------------
def _transform_kernel(h_ref, w_ref, b_ref, zself_ref, zneigh_ref):
    f_out_p = zself_ref.shape[1]
    z = jnp.dot(h_ref[...], w_ref[...], preferred_element_type=jnp.float32)
    zself_ref[...] = z[:, :f_out_p] + b_ref[...]
    zneigh_ref[...] = z[:, f_out_p:].astype(zneigh_ref.dtype)


def _sage_transform(h, w_cat, bias, *, tm):
    n, f_in_p = h.shape
    f_out_p = w_cat.shape[1] // 2
    return pl.pallas_call(
        _transform_kernel,
        out_shape=(
            jax.ShapeDtypeStruct((n, f_out_p), jnp.float32),   # z_self (+bias)
            jax.ShapeDtypeStruct((n, f_out_p), jnp.bfloat16),  # z_neigh
        ),
        grid_spec=pltpu.PrefetchScalarGridSpec(
            num_scalar_prefetch=0,
            grid=(n // tm,),
            in_specs=[
                pl.BlockSpec((tm, f_in_p), lambda i: (i, 0)),
                pl.BlockSpec((f_in_p, 2 * f_out_p), lambda i: (0, 0)),  # [Ws|Wn], resident
                pl.BlockSpec((1, f_out_p), lambda i: (0, 0)),
            ],
            out_specs=(
                pl.BlockSpec((tm, f_out_p), lambda i: (i, 0)),
                pl.BlockSpec((tm, f_out_p), lambda i: (i, 0)),
            ),
        ),
        compiler_params=pltpu.CompilerParams(
            dimension_semantics=("parallel",),
        ),
    )(h, w_cat, bias)


# ---------------------------------------------------------------------------
# Kernel 2: tiled neighbor aggregation + fused epilogue.
#   out = inv_deg * (A_mask @ z_neigh) + z_self     (ReLU if not last layer)
# Grid (row_tiles, k_tiles). A streamed as int8 0/1, upcast to bf16 in-kernel.
# z_neigh is VMEM-resident (constant index_map), sliced per k step.
# Accumulates directly into out_ref when the output is f32 (final layer);
# otherwise an f32 scratch accumulator + bf16 store in the epilogue.
# ---------------------------------------------------------------------------
def _aggregate_kernel(inv_ref, a_ref, zn_ref, zs_ref, out_ref, *scratch, apply_relu):
    acc_ref = scratch[0] if scratch else out_ref
    k = pl.program_id(1)
    tk = a_ref.shape[1]

    @pl.when(k == 0)
    def _():
        acc_ref[...] = jnp.zeros_like(acc_ref)

    a = a_ref[...].astype(jnp.bfloat16)            # int8 mask -> bf16 (VPU, hidden under HBM bound)
    start = pl.multiple_of(k * tk, tk)
    zn = zn_ref[pl.ds(start, tk), :]               # k-slab from VMEM-resident z_neigh
    acc_ref[...] += jnp.dot(a, zn, preferred_element_type=jnp.float32)

    @pl.when(k == pl.num_programs(1) - 1)
    def _():
        out = inv_ref[...] * acc_ref[...] + zs_ref[...]   # exact f32 1/deg row scale
        if apply_relu:
            out = jnp.maximum(out, 0.0)
        out_ref[...] = out.astype(out_ref.dtype)


def _sage_aggregate(a_mask, inv_deg, z_neigh, z_self, *, apply_relu, out_dtype, tm, tk):
    n = a_mask.shape[0]
    f_out_p = z_neigh.shape[1]
    direct_acc = jnp.dtype(out_dtype) == jnp.dtype(jnp.float32)
    scratch_shapes = [] if direct_acc else [pltpu.VMEM((tm, f_out_p), jnp.float32)]
    kernel = functools.partial(_aggregate_kernel, apply_relu=apply_relu)
    return pl.pallas_call(
        kernel,
        out_shape=jax.ShapeDtypeStruct((n, f_out_p), out_dtype),
        grid_spec=pltpu.PrefetchScalarGridSpec(
            num_scalar_prefetch=0,
            grid=(n // tm, n // tk),
            in_specs=[
                pl.BlockSpec((tm, 1), lambda i, k: (i, 0)),         # 1/deg row scale (f32)
                pl.BlockSpec((tm, tk), lambda i, k: (i, k)),        # int8 adjacency mask tile
                pl.BlockSpec((n, f_out_p), lambda i, k: (0, 0)),    # z_neigh, VMEM-resident
                pl.BlockSpec((tm, f_out_p), lambda i, k: (i, 0)),   # z_self row-slab (f32)
            ],
            out_specs=pl.BlockSpec((tm, f_out_p), lambda i, k: (i, 0)),
            scratch_shapes=scratch_shapes,
        ),
        compiler_params=pltpu.CompilerParams(
            dimension_semantics=("parallel", "arbitrary"),
            vmem_limit_bytes=48 * 1024 * 1024,
        ),
    )(inv_deg, a_mask, z_neigh, z_self)


def sage_conv(a_mask, inv_deg, h, w_cat, bias, *, apply_relu, out_dtype, tm, tk):
    """One SAGEConv ('mean') layer: hoisted dense transforms + tiled aggregation."""
    z_self, z_neigh = _sage_transform(h, w_cat, bias, tm=tm)
    return _sage_aggregate(
        a_mask, inv_deg, z_neigh, z_self,
        apply_relu=apply_relu, out_dtype=out_dtype, tm=tm, tk=tk,
    )


def graphsage_forward(adj, x, params, *, tm=256, tk=512):
    """GraphSAGE.forward: dropout (identity at eval) -> stacked SAGEConv layers.

    adj: dense binary adjacency (adj[i, j] = 1 iff edge j->i), any float/int dtype.
    params: list of dicts with 'w_self', 'w_neigh', 'b'.
    ReLU between layers, no activation after the final layer.
    Tile sizes: tm 256-512 (keep >= 2 row tiles for megacore), raise tk toward
    1024-2048 on v6e/v7x for large graphs (mind the 64 MiB VMEM on v7x).
    """
    n, in_feats = x.shape
    n_classes = params[-1]["w_self"].shape[1]

    # Pad node count to lcm(tm, tk) and feature dims to 128 lanes.
    # Zero padding keeps the math exact for the real nodes.
    n_p = _round_up(n, math.lcm(tm, tk))
    f_in_p = _round_up(in_feats, LANE)

    deg = jnp.maximum(jnp.sum(adj.astype(jnp.float32), axis=1, keepdims=True), 1.0)
    inv_deg = jnp.pad(1.0 / deg, ((0, n_p - n), (0, 0))).astype(jnp.float32)
    a_mask = jnp.pad((adj > 0).astype(jnp.int8), ((0, n_p - n), (0, n_p - n)))
    h = jnp.pad(x, ((0, n_p - n), (0, f_in_p - in_feats))).astype(jnp.bfloat16)

    n_layers = len(params)
    h_out = None
    for l, p in enumerate(params):
        f_in, f_out = p["w_self"].shape
        f_in_pad = _round_up(f_in, LANE)
        f_out_pad = _round_up(f_out, LANE)
        ws = jnp.pad(p["w_self"], ((0, f_in_pad - f_in), (0, f_out_pad - f_out)))
        wn = jnp.pad(p["w_neigh"], ((0, f_in_pad - f_in), (0, f_out_pad - f_out)))
        # Concatenate [Ws|Wn] so the transform matmul fills the 256-wide MXU on v6e/v7x.
        w_cat = jnp.concatenate([ws, wn], axis=1).astype(jnp.bfloat16)
        b = jnp.pad(p["b"], ((0, 0), (0, f_out_pad - f_out))).astype(jnp.float32)

        is_last = l == n_layers - 1
        out_dtype = jnp.float32 if is_last else jnp.bfloat16
        h_out = sage_conv(
            a_mask, inv_deg, h, w_cat, b,
            apply_relu=not is_last, out_dtype=out_dtype, tm=tm, tk=tk,
        )
        if not is_last:
            # kernel already emitted bf16 + ReLU; inter-layer dropout is identity in eval
            h = h_out

    return h_out[:n, :n_classes]


def build_adjacency(key, n_nodes, p_edge=0.15):
    """Random directed binary adjacency (adj[i, j] = 1 iff edge j->i)."""
    return (jax.random.uniform(key, (n_nodes, n_nodes)) < p_edge).astype(jnp.float32)


def init_params(key, in_feats, n_hidden, n_classes, n_layers):
    """Deterministic parameter init matching GraphSAGE.__init__ layer shapes."""
    dims = [in_feats] + [n_hidden] * n_layers + [n_classes]
    params = []
    for i in range(len(dims) - 1):
        f_in, f_out = dims[i], dims[i + 1]
        key, k1, k2 = jax.random.split(key, 3)
        scale = 1.0 / jnp.sqrt(jnp.float32(f_in))
        params.append(
            {
                "w_self": jax.random.normal(k1, (f_in, f_out), jnp.float32) * scale,
                "w_neigh": jax.random.normal(k2, (f_in, f_out), jnp.float32) * scale,
                "b": jnp.zeros((1, f_out), jnp.float32),
            }
        )
    return params


if __name__ == "__main__":
    # Small shapes consistent with the module's forward (still exercises the
    # (rows, k) tiling: N=512 with 256x256 tiles -> grid (2, 2)).
    N_NODES = 512
    IN_FEATS = 32
    N_HIDDEN = 32
    N_CLASSES = 16
    N_LAYERS = 2  # -> total SAGEConv layers = N_LAYERS + 1 = 3

    key = jax.random.PRNGKey(0)
    k_graph, k_feat, k_param = jax.random.split(key, 3)

    adj = build_adjacency(k_graph, N_NODES)
    x = jax.random.normal(k_feat, (N_NODES, IN_FEATS), jnp.float32)
    params = init_params(k_param, IN_FEATS, N_HIDDEN, N_CLASSES, N_LAYERS)

    fwd = jax.jit(functools.partial(graphsage_forward, tm=256, tk=256))
    out = jax.block_until_ready(fwd(adj, x, params))

    # Pure-JAX f32 reference (same math, no Pallas). bf16 streaming of H/W/z_neigh
    # with f32 accumulation and exact f32 1/deg scaling stays well within tolerance.
    deg = jnp.maximum(jnp.sum(adj, axis=1, keepdims=True), 1.0)
    a_norm = adj / deg
    h_ref = x
    for l, p in enumerate(params):
        h_ref = h_ref @ p["w_self"] + a_norm @ (h_ref @ p["w_neigh"]) + p["b"]
        if l != len(params) - 1:
            h_ref = jnp.maximum(h_ref, 0.0)

    assert out.shape == (N_NODES, N_CLASSES)
    max_err = float(jnp.max(jnp.abs(out - h_ref)))
    assert jnp.allclose(out, h_ref, atol=5e-2, rtol=5e-2), f"max_err={max_err}"

    print("KERNEL_OK")
</pallas_src>

<mosaic_0001>
module attributes {stable_mosaic.version = 11 : i64} {
  func.func @_aggregate_kernel(%arg0: i32, %arg1: i32, %arg2: memref<256x1xf32, #tpu.memory_space<vmem>>, %arg3: memref<256x256xi8, #tpu.memory_space<vmem>>, %arg4: memref<512x128xbf16, #tpu.memory_space<vmem>>, %arg5: memref<256x128xf32, #tpu.memory_space<vmem>>, %arg6: memref<256x128xbf16, #tpu.memory_space<vmem>>, %arg7: memref<256x128xf32, #tpu.memory_space<vmem>>) attributes {dimension_semantics = [#tpu.dimension_semantics<parallel>, #tpu.dimension_semantics<arbitrary>], iteration_bounds = array<i64: 2, 2>, scalar_prefetch = 0 : i64, scratch_operands = 1 : i64, tpu.core_type = #tpu.core_type<tc>, window_params = [{transform_indices = @transform_0, window_bounds = array<i64: 256, 1>}, {transform_indices = @transform_1, window_bounds = array<i64: 256, 256>}, {pipeline_mode = #tpu.pipeline_mode<synchronous>, transform_indices = @transform_2, window_bounds = array<i64: 512, 128>}, {transform_indices = @transform_3, window_bounds = array<i64: 256, 128>}, {transform_indices = @transform_4, window_bounds = array<i64: 256, 128>}]} {
    %c0_i32 = arith.constant 0 : i32
    %0 = arith.cmpi eq, %arg1, %c0_i32 : i32
    %1 = arith.extui %0 : i1 to i32
    %c0_i32_0 = arith.constant 0 : i32
    %2 = arith.cmpi ne, %1, %c0_i32_0 : i32
    scf.if %2 {
      %cst_8 = arith.constant 0.000000e+00 : f32
      %16 = vector.broadcast %cst_8 : f32 to vector<256x128xf32>
      %c0_9 = arith.constant 0 : index
      %c0_10 = arith.constant 0 : index
      %17 = vector.load %arg7[%c0_9, %c0_10] : memref<256x128xf32, #tpu.memory_space<vmem>>, vector<256x128xf32>
      tpu.vector_store %arg7[%c0_9, %c0_10], %16 {strides = array<i32>} : memref<256x128xf32, #tpu.memory_space<vmem>>, vector<256x128xf32>,
    } else {
    }
    %c0 = arith.constant 0 : index
    %c0_1 = arith.constant 0 : index
    %3 = vector.load %arg3[%c0, %c0_1] : memref<256x256xi8, #tpu.memory_space<vmem>>, vector<256x256xi8>
    %4 = arith.sitofp %3 : vector<256x256xi8> to vector<256x256xbf16>
    %c256_i32 = arith.constant 256 : i32
    %5 = arith.muli %arg1, %c256_i32 : i32
    %6 = tpu.assume_multiple %5, 256 : i32
    %7 = arith.index_cast %6 : i32 to index
    %c0_2 = arith.constant 0 : index
    %8 = vector.load %arg4[%7, %c0_2] : memref<512x128xbf16, #tpu.memory_space<vmem>>, vector<256x128xbf16>
    %c0_3 = arith.constant 0 : index
    %c0_4 = arith.constant 0 : index
    %9 = vector.load %arg7[%c0_3, %c0_4] : memref<256x128xf32, #tpu.memory_space<vmem>>, vector<256x128xf32>
    %cst = arith.constant dense<0.000000e+00> : vector<256x128xf32>
    %10 = tpu.matmul %4, %8, %cst {dimension_numbers = #tpu.dot_dimension_numbers<[1], [0], [0], [1], [0, 0, 1, 1], [], []>} : vector<256x256xbf16>, vector<256x128xbf16>, vector<256x128xf32> -> vector<256x128xf32>
    %11 = arith.addf %9, %10 : vector<256x128xf32>
    %c0_5 = arith.constant 0 : index
    %c0_6 = arith.constant 0 : index
    %12 = vector.load %arg7[%c0_5, %c0_6] : memref<256x128xf32, #tpu.memory_space<vmem>>, vector<256x128xf32>
    tpu.vector_store %arg7[%c0_5, %c0_6], %11 {strides = array<i32>} : memref<256x128xf32, #tpu.memory_space<vmem>>, vector<256x128xf32>,
    %c1_i32 = arith.constant 1 : i32
    %13 = arith.cmpi eq, %arg1, %c1_i32 : i32
    %14 = arith.extui %13 : i1 to i32
    %c0_i32_7 = arith.constant 0 : i32
    %15 = arith.cmpi ne, %14, %c0_i32_7 : i32
    scf.if %15 {
      %c0_8 = arith.constant 0 : index
      %c0_9 = arith.constant 0 : index
      %16 = vector.load %arg2[%c0_8, %c0_9] : memref<256x1xf32, #tpu.memory_space<vmem>>, vector<256x1xf32>
      %c0_10 = arith.constant 0 : index
      %c0_11 = arith.constant 0 : index
      %17 = vector.load %arg7[%c0_10, %c0_11] : memref<256x128xf32, #tpu.memory_space<vmem>>, vector<256x128xf32>
      %18 = vector.broadcast %16 : vector<256x1xf32> to vector<256x128xf32>
      %19 = arith.mulf %18, %17 : vector<256x128xf32>
      %c0_12 = arith.constant 0 : index
      %c0_13 = arith.constant 0 : index
      %20 = vector.load %arg5[%c0_12, %c0_13] : memref<256x128xf32, #tpu.memory_space<vmem>>, vector<256x128xf32>
      %21 = arith.addf %19, %20 : vector<256x128xf32>
      %cst_14 = arith.constant 0.000000e+00 : f32
      %22 = vector.broadcast %cst_14 : f32 to vector<256x128xf32>
      %23 = arith.maximumf %21, %22 : vector<256x128xf32>
      %24 = arith.truncf %23 : vector<256x128xf32> to vector<256x128xbf16>
      %c0_15 = arith.constant 0 : index
      %c0_16 = arith.constant 0 : index
      %25 = vector.load %arg6[%c0_15, %c0_16] : memref<256x128xbf16, #tpu.memory_space<vmem>>, vector<256x128xbf16>
      tpu.vector_store %arg6[%c0_15, %c0_16], %24 {strides = array<i32>} : memref<256x128xbf16, #tpu.memory_space<vmem>>, vector<256x128xbf16>,
    } else {
    }
    return
  }
  func.func @transform_0(%arg0: i32, %arg1: i32) -> (i32, i32) {
    %c0_i32 = arith.constant 0 : i32
    %c0_i32_0 = arith.constant 0 : i32
    return %arg0, %c0_i32 : i32, i32
  }
  func.func @transform_1(%arg0: i32, %arg1: i32) -> (i32, i32) {
    %c0_i32 = arith.constant 0 : i32
    return %arg0, %arg1 : i32, i32
  }
  func.func @transform_2(%arg0: i32, %arg1: i32) -> (i32, i32) {
    %c0_i32 = arith.constant 0 : i32
    %c0_i32_0 = arith.constant 0 : i32
    %c0_i32_1 = arith.constant 0 : i32
    return %c0_i32, %c0_i32_0 : i32, i32
  }
  func.func @transform_3(%arg0: i32, %arg1: i32) -> (i32, i32) {
    %c0_i32 = arith.constant 0 : i32
    %c0_i32_0 = arith.constant 0 : i32
    return %arg0, %c0_i32 : i32, i32
  }
  func.func @transform_4(%arg0: i32, %arg1: i32) -> (i32, i32) {
    %c0_i32 = arith.constant 0 : i32
    %c0_i32_0 = arith.constant 0 : i32
    return %arg0, %c0_i32 : i32, i32
  }
}

module attributes {stable_mosaic.version = 11 : i64} {
  func.func @_transform_kernel(%arg0: i32, %arg1: memref<256x128xbf16, #tpu.memory_space<vmem>>, %arg2: memref<128x256xbf16, #tpu.memory_space<vmem>>, %arg3: memref<1x128xf32, #tpu.memory_space<vmem>>, %arg4: memref<256x128xf32, #tpu.memory_space<vmem>>, %arg5: memref<256x128xbf16, #tpu.memory_space<vmem>>) attributes {dimension_semantics = [#tpu.dimension_semantics<parallel>], iteration_bounds = array<i64: 2>, scalar_prefetch = 0 : i64, scratch_operands = 0 : i64, tpu.core_type = #tpu.core_type<tc>, window_params = [{transform_indices = @transform_0, window_bounds = array<i64: 256, 128>}, {pipeline_mode = #tpu.pipeline_mode<synchronous>, transform_indices = @transform_1, window_bounds = array<i64: 128, 256>}, {pipeline_mode = #tpu.pipeline_mode<synchronous>, transform_indices = @transform_2, window_bounds = array<i64: 1, 128>}, {transform_indices = @transform_3, window_bounds = array<i64: 256, 128>}, {transform_indices = @transform_4, window_bounds = array<i64: 256, 128>}]} {
    %c0 = arith.constant 0 : index
    %c0_0 = arith.constant 0 : index
    %0 = vector.load %arg1[%c0, %c0_0] : memref<256x128xbf16, #tpu.memory_space<vmem>>, vector<256x128xbf16>
    %c0_1 = arith.constant 0 : index
    %c0_2 = arith.constant 0 : index
    %1 = vector.load %arg2[%c0_1, %c0_2] : memref<128x256xbf16, #tpu.memory_space<vmem>>, vector<128x256xbf16>
    %cst = arith.constant dense<0.000000e+00> : vector<256x256xf32>
    %2 = tpu.matmul %0, %1, %cst {dimension_numbers = #tpu.dot_dimension_numbers<[1], [0], [0], [1], [0, 0, 1, 1], [], []>} : vector<256x128xbf16>, vector<128x256xbf16>, vector<256x256xf32> -> vector<256x256xf32>
    %3 = vector.extract_strided_slice %2 {offsets = [0, 0], sizes = [256, 128], strides = [1, 1]} : vector<256x256xf32> to vector<256x128xf32>
    %c0_3 = arith.constant 0 : index
    %c0_4 = arith.constant 0 : index
    %4 = vector.load %arg3[%c0_3, %c0_4] : memref<1x128xf32, #tpu.memory_space<vmem>>, vector<1x128xf32>
    %5 = vector.broadcast %4 : vector<1x128xf32> to vector<256x128xf32>
    %6 = arith.addf %3, %5 : vector<256x128xf32>
    %c0_5 = arith.constant 0 : index
    %c0_6 = arith.constant 0 : index
    %7 = vector.load %arg4[%c0_5, %c0_6] : memref<256x128xf32, #tpu.memory_space<vmem>>, vector<256x128xf32>
    tpu.vector_store %arg4[%c0_5, %c0_6], %6 {strides = array<i32>} : memref<256x128xf32, #tpu.memory_space<vmem>>, vector<256x128xf32>,
    %8 = vector.extract_strided_slice %2 {offsets = [0, 128], sizes = [256, 128], strides = [1, 1]} : vector<256x256xf32> to vector<256x128xf32>
    %9 = arith.truncf %8 : vector<256x128xf32> to vector<256x128xbf16>
    %c0_7 = arith.constant 0 : index
    %c0_8 = arith.constant 0 : index
    %10 = vector.load %arg5[%c0_7, %c0_8] : memref<256x128xbf16, #tpu.memory_space<vmem>>, vector<256x128xbf16>
    tpu.vector_store %arg5[%c0_7, %c0_8], %9 {strides = array<i32>} : memref<256x128xbf16, #tpu.memory_space<vmem>>, vector<256x128xbf16>,
    return
  }
  func.func @transform_0(%arg0: i32) -> (i32, i32) {
    %c0_i32 = arith.constant 0 : i32
    %c0_i32_0 = arith.constant 0 : i32
    return %arg0, %c0_i32 : i32, i32
  }
  func.func @transform_1(%arg0: i32) -> (i32, i32) {
    %c0_i32 = arith.constant 0 : i32
    %c0_i32_0 = arith.constant 0 : i32
    %c0_i32_1 = arith.constant 0 : i32
    return %c0_i32, %c0_i32_0 : i32, i32
  }
  func.func @transform_2(%arg0: i32) -> (i32, i32) {
    %c0_i32 = arith.constant 0 : i32
    %c0_i32_0 = arith.constant 0 : i32
    %c0_i32_1 = arith.constant 0 : i32
    return %c0_i32, %c0_i32_0 : i32, i32
  }
  func.func @transform_3(%arg0: i32) -> (i32, i32) {
    %c0_i32 = arith.constant 0 : i32
    %c0_i32_0 = arith.constant 0 : i32
    return %arg0, %c0_i32 : i32, i32
  }
  func.func @transform_4(%arg0: i32) -> (i32, i32) {
    %c0_i32 = arith.constant 0 : i32
    %c0_i32_0 = arith.constant 0 : i32
    return %arg0, %c0_i32 : i32, i32
  }
}

module attributes {stable_mosaic.version = 11 : i64} {
  func.func @_aggregate_kernel(%arg0: i32, %arg1: i32, %arg2: memref<256x1xf32, #tpu.memory_space<vmem>>, %arg3: memref<256x256xi8, #tpu.memory_space<vmem>>, %arg4: memref<512x128xbf16, #tpu.memory_space<vmem>>, %arg5: memref<256x128xf32, #tpu.memory_space<vmem>>, %arg6: memref<256x128xf32, #tpu.memory_space<vmem>>) attributes {dimension_semantics = [#tpu.dimension_semantics<parallel>, #tpu.dimension_semantics<arbitrary>], iteration_bounds = array<i64: 2, 2>, scalar_prefetch = 0 : i64, scratch_operands = 0 : i64, tpu.core_type = #tpu.core_type<tc>, window_params = [{transform_indices = @transform_0, window_bounds = array<i64: 256, 1>}, {transform_indices = @transform_1, window_bounds = array<i64: 256, 256>}, {pipeline_mode = #tpu.pipeline_mode<synchronous>, transform_indices = @transform_2, window_bounds = array<i64: 512, 128>}, {transform_indices = @transform_3, window_bounds = array<i64: 256, 128>}, {transform_indices = @transform_4, window_bounds = array<i64: 256, 128>}]} {
    %c0_i32 = arith.constant 0 : i32
    %0 = arith.cmpi eq, %arg1, %c0_i32 : i32
    %1 = arith.extui %0 : i1 to i32
    %c0_i32_0 = arith.constant 0 : i32
    %2 = arith.cmpi ne, %1, %c0_i32_0 : i32
    scf.if %2 {
      %cst_8 = arith.constant 0.000000e+00 : f32
      %16 = vector.broadcast %cst_8 : f32 to vector<256x128xf32>
      %c0_9 = arith.constant 0 : index
      %c0_10 = arith.constant 0 : index
      %17 = vector.load %arg6[%c0_9, %c0_10] : memref<256x128xf32, #tpu.memory_space<vmem>>, vector<256x128xf32>
      tpu.vector_store %arg6[%c0_9, %c0_10], %16 {strides = array<i32>} : memref<256x128xf32, #tpu.memory_space<vmem>>, vector<256x128xf32>,
    } else {
    }
    %c0 = arith.constant 0 : index
    %c0_1 = arith.constant 0 : index
    %3 = vector.load %arg3[%c0, %c0_1] : memref<256x256xi8, #tpu.memory_space<vmem>>, vector<256x256xi8>
    %4 = arith.sitofp %3 : vector<256x256xi8> to vector<256x256xbf16>
    %c256_i32 = arith.constant 256 : i32
    %5 = arith.muli %arg1, %c256_i32 : i32
    %6 = tpu.assume_multiple %5, 256 : i32
    %7 = arith.index_cast %6 : i32 to index
    %c0_2 = arith.constant 0 : index
    %8 = vector.load %arg4[%7, %c0_2] : memref<512x128xbf16, #tpu.memory_space<vmem>>, vector<256x128xbf16>
    %c0_3 = arith.constant 0 : index
    %c0_4 = arith.constant 0 : index
    %9 = vector.load %arg6[%c0_3, %c0_4] : memref<256x128xf32, #tpu.memory_space<vmem>>, vector<256x128xf32>
    %cst = arith.constant dense<0.000000e+00> : vector<256x128xf32>
    %10 = tpu.matmul %4, %8, %cst {dimension_numbers = #tpu.dot_dimension_numbers<[1], [0], [0], [1], [0, 0, 1, 1], [], []>} : vector<256x256xbf16>, vector<256x128xbf16>, vector<256x128xf32> -> vector<256x128xf32>
    %11 = arith.addf %9, %10 : vector<256x128xf32>
    %c0_5 = arith.constant 0 : index
    %c0_6 = arith.constant 0 : index
    %12 = vector.load %arg6[%c0_5, %c0_6] : memref<256x128xf32, #tpu.memory_space<vmem>>, vector<256x128xf32>
    tpu.vector_store %arg6[%c0_5, %c0_6], %11 {strides = array<i32>} : memref<256x128xf32, #tpu.memory_space<vmem>>, vector<256x128xf32>,
    %c1_i32 = arith.constant 1 : i32
    %13 = arith.cmpi eq, %arg1, %c1_i32 : i32
    %14 = arith.extui %13 : i1 to i32
    %c0_i32_7 = arith.constant 0 : i32
    %15 = arith.cmpi ne, %14, %c0_i32_7 : i32
    scf.if %15 {
      %c0_8 = arith.constant 0 : index
      %c0_9 = arith.constant 0 : index
      %16 = vector.load %arg2[%c0_8, %c0_9] : memref<256x1xf32, #tpu.memory_space<vmem>>, vector<256x1xf32>
      %c0_10 = arith.constant 0 : index
      %c0_11 = arith.constant 0 : index
      %17 = vector.load %arg6[%c0_10, %c0_11] : memref<256x128xf32, #tpu.memory_space<vmem>>, vector<256x128xf32>
      %18 = vector.broadcast %16 : vector<256x1xf32> to vector<256x128xf32>
      %19 = arith.mulf %18, %17 : vector<256x128xf32>
      %c0_12 = arith.constant 0 : index
      %c0_13 = arith.constant 0 : index
      %20 = vector.load %arg5[%c0_12, %c0_13] : memref<256x128xf32, #tpu.memory_space<vmem>>, vector<256x128xf32>
      %21 = arith.addf %19, %20 : vector<256x128xf32>
      %c0_14 = arith.constant 0 : index
      %c0_15 = arith.constant 0 : index
      %22 = vector.load %arg6[%c0_14, %c0_15] : memref<256x128xf32, #tpu.memory_space<vmem>>, vector<256x128xf32>
      tpu.vector_store %arg6[%c0_14, %c0_15], %21 {strides = array<i32>} : memref<256x128xf32, #tpu.memory_space<vmem>>, vector<256x128xf32>,
    } else {
    }
    return
  }
  func.func @transform_0(%arg0: i32, %arg1: i32) -> (i32, i32) {
    %c0_i32 = arith.constant 0 : i32
    %c0_i32_0 = arith.constant 0 : i32
    return %arg0, %c0_i32 : i32, i32
  }
  func.func @transform_1(%arg0: i32, %arg1: i32) -> (i32, i32) {
    %c0_i32 = arith.constant 0 : i32
    return %arg0, %arg1 : i32, i32
  }
  func.func @transform_2(%arg0: i32, %arg1: i32) -> (i32, i32) {
    %c0_i32 = arith.constant 0 : i32
    %c0_i32_0 = arith.constant 0 : i32
    %c0_i32_1 = arith.constant 0 : i32
    return %c0_i32, %c0_i32_0 : i32, i32
  }
  func.func @transform_3(%arg0: i32, %arg1: i32) -> (i32, i32) {
    %c0_i32 = arith.constant 0 : i32
    %c0_i32_0 = arith.constant 0 : i32
    return %arg0, %c0_i32 : i32, i32
  }
  func.func @transform_4(%arg0: i32, %arg1: i32) -> (i32, i32) {
    %c0_i32 = arith.constant 0 : i32
    %c0_i32_0 = arith.constant 0 : i32
    return %arg0, %c0_i32 : i32, i32
  }
}

</mosaic_0001>

<bundles_post_ra>
// kernel: graphsage_forward.7
= control target key start
LH: loop header
LB: loop body
LE: loop exit
PB: predicated region body
PF: predicated region fallthrough
CT: control target
= control target key end

     0   :  { %s1892_s15 = smov 0   ;;  %s1894_s16 = smov 0   ;;  %s2140_s0 = inlined_call_operand.vmem [shape: f32[512,1], index: 0, kind: input, shape index: {}]   ;;  %s2141_s1 = inlined_call_operand.vmem [shape: s8[512,512], index: 1, kind: input, shape index: {}]   ;;  %s2142_s2 = inlined_call_operand.vmem [shape: bf16[512,128], index: 2, kind: input, shape index: {}]   ;;  %s2143_s3 = inlined_call_operand.vmem [shape: f32[512,128], index: 3, kind: input, shape index: {}]   ;;  %s2144_s4 = inlined_call_operand.vmem [shape: bf16[512,128], index: 4, kind: output, shape index: {}]  }
   0x1   :  { %s1896_s17 = smov 0   ;;  %s1898_s18 = smov 0  }
   0x2   :  { %s1900_s19 = smov 0   ;;  %s1902_s20 = smov 0  }
   0x3   :  { %s1904_s21 = smov 0  }
   0x4 LB: > { %s23_s22 = sadd.s32 1, %s1855_s19  ;;  %s26_s23 = sadd.s32 1, %s1859_s20  ;;  %s1863_s21 = sphi %s1904_s21, %s14_s21   ;;  %s1859_s20 = sphi %s1902_s20, %s2150_s20   ;;  %s1855_s19 = sphi %s1900_s19, %s2149_s19   ;;  %s1851_s18 = sphi %s1898_s18, %s2148_s18   ;;  %s1847_s17 = sphi %s1896_s17, %s2147_s17   ;;  %s1843_s16 = sphi %s1894_s16, %s2146_s16   ;;  %s1839_s15 = sphi %s1892_s15, %s2145_s15  }
   0x5   : > { %p24_p0 = scmp.ge.s32.totalorder %s23_s22, 2  ;;  %p68_p1 = scmp.ne.s32.totalorder %s1843_s16, %s1839_s15 }
   0x6   : > { %p69_p2 = scmp.eq.s32.totalorder %s1863_s21, 0  ;;  %s61_s27 = sadd.s32 1, %s1843_s16 }
   0x7   : > { %s2152_s22 = smov (%p24_p0, %s23_s22), 0  ;;  %s2154_s23 = smov (!%p24_p0, %s26_s23), %s1859_s20 }
   0x8   : > { %p70_p3 = por %p69_p2, %p68_p1  ;;  %p28_p4 = scmp.ge.s32.totalorder %s2154_s23, 2 }
   0x9   : > { %s57_s24 = ssub.s32 %s1855_s19, %s2152_s22  ;;  %p1409_p6 = scmp.ge.s32.totalorder %s1863_s21, 4 }
   0xa   : > { %s2156_s23 = smov (%p28_p4, %s2154_s23), 0 }
   0xb   : > { %s56_s25 = ssub.s32 %s1859_s20, %s2156_s23  ;;  %170 = sbr.rel (%p1409_p6) target bundleno = 31 (0x1f), region = 20 }
   0xc   : > { %s58_s26 = sor.u32 %s57_s24, %s56_s25 }
   0xd   : > { %p59_p5 = scmp.eq.s32.totalorder %s58_s26, 0 }
   0xf   : > { %s1943_s28 = scalar_select %p59_p5, %s1843_s16, %s61_s27  }
  0x10   : > { %182 = sbr.rel (!%p70_p3) target bundleno = 31 (0x1f), region = 28  ;;  %s184_s29 = sand.u32 (%p70_p3), 1, %s1843_s16  }
  0x11   : > { %s1412_s30 = sshll.u32 (%p70_p3), %s1855_s19, 1  ;;  %s1410_s5 = sshll.u32 (%p70_p3), %s184_s29, 7 }
  0x12   : > { %s1477_s6 = sshll.u32 (%p70_p3), %s1859_s20, 5  ;;  %s186_s12 = scalar_lea.vmem (%p70_p3), [#allocation3], %s1410_s5 }
  0x13   : > { %s190_s7 = sadd.s32 (%p70_p3), %s1477_s6, %s1412_s30 }
  0x14   : > { %s1414_s8 = sshll.u32 (%p70_p3), %s190_s7, 3 }
  0x15   : > { %s1952_s11 = scalar_lea.vmem %s2141_s1, %s1414_s8 }
  0x16   : > { %v205_v0 = vld [vmem:[%s1952_s11] sm:$0xff]  ;;  %v207_v1 = vld [vmem:[%s1952_s11 + $0x8] sm:$0xff] }
  0x17   : > { %v209_v2 = vld [vmem:[%s1952_s11 + $0x20] sm:$0xff]  ;;  %206 = vst [vmem:[%s186_s12] sm:$0xff] %v205_v0  ;;  %208 = vst [vmem:[%s186_s12 + $0x8] sm:$0xff] %v207_v1  ;;  %v211_v3 = vld [vmem:[%s1952_s11 + $0x28] sm:$0xff] }
  0x18   : > { %210 = vst [vmem:[%s186_s12 + $0x10] sm:$0xff] %v209_v2  ;;  %v213_v4 = vld [vmem:[%s1952_s11 + $0x40] sm:$0xff]  ;;  %v215_v5 = vld [vmem:[%s1952_s11 + $0x48] sm:$0xff]  ;;  %212 = vst [vmem:[%s186_s12 + $0x18] sm:$0xff] %v211_v3 }
  0x19   : > { %214 = vst [vmem:[%s186_s12 + $0x20] sm:$0xff] %v213_v4  ;;  %216 = vst [vmem:[%s186_s12 + $0x28] sm:$0xff] %v215_v5  ;;  %v217_v6 = vld [vmem:[%s1952_s11 + $0x60] sm:$0xff]  ;;  %v219_v7 = vld [vmem:[%s1952_s11 + $0x68] sm:$0xff] }
  0x1a   : > { %v221_v8 = vld [vmem:[%s1952_s11 + $0x80] sm:$0xff]  ;;  %218 = vst [vmem:[%s186_s12 + $0x30] sm:$0xff] %v217_v6  ;;  %220 = vst [vmem:[%s186_s12 + $0x38] sm:$0xff] %v219_v7  ;;  %v223_v9 = vld [vmem:[%s1952_s11 + $0x88] sm:$0xff] }
  0x1b   : > { %222 = vst [vmem:[%s186_s12 + $0x40] sm:$0xff] %v221_v8  ;;  %v225_v10 = vld [vmem:[%s1952_s11 + $0xa0] sm:$0xff]  ;;  %v227_v11 = vld [vmem:[%s1952_s11 + $0xa8] sm:$0xff]  ;;  %224 = vst [vmem:[%s186_s12 + $0x48] sm:$0xff] %v223_v9 }
  0x1c   : > { %226 = vst [vmem:[%s186_s12 + $0x50] sm:$0xff] %v225_v10  ;;  %228 = vst [vmem:[%s186_s12 + $0x58] sm:$0xff] %v227_v11  ;;  %v229_v12 = vld [vmem:[%s1952_s11 + $0xc0] sm:$0xff]  ;;  %v231_v13 = vld [vmem:[%s1952_s11 + $0xc8] sm:$0xff] }
  0x1d   : > { %v233_v14 = vld [vmem:[%s1952_s11 + $0xe0] sm:$0xff]  ;;  %230 = vst [vmem:[%s186_s12 + $0x60] sm:$0xff] %v229_v12  ;;  %232 = vst [vmem:[%s186_s12 + $0x68] sm:$0xff] %v231_v13  ;;  %v235_v15 = vld [vmem:[%s1952_s11 + $0xe8] sm:$0xff] }
  0x1e   : > { %234 = vst [vmem:[%s186_s12 + $0x70] sm:$0xff] %v233_v14  ;;  %236 = vst [vmem:[%s186_s12 + $0x78] sm:$0xff] %v235_v15 }
  0x1f PF: > { %p1415_p7 = scmp.ge.s32.totalorder %s1863_s21, 1  ;;  %p250_p8 = scmp.lt.s32.totalorder %s1863_s21, 5 }
  0x21   : > { %p251_p9 = pnand %p1415_p7, %p250_p8 }
  0x22   : > { %s257_s13 = sand.u32 (!%p251_p9), 1, %s1839_s15   ;;  %s1417_s14 = sshll.u32 (!%p251_p9), %s1851_s18, 5 }
  0x23   : > { %254 = sbr.rel (%p251_p9) target bundleno = 554 (0x22a), region = 55  ;;  %s1416_s24 = sshll.u32 (!%p251_p9), %s257_s13, 7 }
  0x24   : > { %p293_p10 = scmp.lt.s32.totalorder (!%p251_p9), %s1417_s14, 63  ;;  %s1989_s18 = scalar_lea.vmem (!%p251_p9), [#allocation3], %s1416_s24 }
  0x25   : > { %p1423_p11 = scmp.ne.s32.totalorder (!%p251_p9), %s1847_s17, 0 }
  0x28   : > { %s2158_s14 = smov (!%p293_p10, %s1417_s14), 63  ;;  %316 = sbr.rel (%p1423_p11) target bundleno = 62 (0x3e), region = 63 }
  0x29   : > { %s1418_s25 = sshll.u32 %s2158_s14, 3  ;;  %s1422_s26 = sshll.u32 %s2158_s14, 2 }
  0x2a   : > { %s1977_s30 = scalar_lea.vmem %s2140_s0, %s1418_s25  ;;  %s1982_s7 = scalar_lea.vmem %s2143_s3, %s1418_s25 }
  0x2b   : > { %s1987_s15 = scalar_lea.vmem %s2144_s4, %s1422_s26 }
  0x2d   : > { %v1865_v16 = vmov 0.0  }
  0x2e   : > { %317 = vst [vmem:[#allocation2 + $0xb0] sm:$0xff] %v1865_v16  ;;  %318 = vst [vmem:[#allocation2] sm:$0xff] %v1865_v16 }
  0x2f   : > { %319 = vst [vmem:[#allocation2 + $0xd8] sm:$0xff] %v1865_v16  ;;  %320 = vst [vmem:[#allocation2 + $0x18] sm:$0xff] %v1865_v16 }
  0x30   : > { %321 = vst [vmem:[#allocation2 + $0x50] sm:$0xff] %v1865_v16  ;;  %322 = vst [vmem:[#allocation2 + $0x68] sm:$0xff] %v1865_v16 }
  0x31   : > { %323 = vst [vmem:[#allocation2 + $0x30] sm:$0xff] %v1865_v16  ;;  %324 = vst [vmem:[#allocation2 + $0x48] sm:$0xff] %v1865_v16 }
  0x32   : > { %325 = vst [vmem:[#allocation2 + $0x80] sm:$0xff] %v1865_v16  ;;  %326 = vst [vmem:[#allocation2 + $0x88] sm:$0xff] %v1865_v16 }
  0x33   : > { %327 = vst [vmem:[#allocation2 + $0xe8] sm:$0xff] %v1865_v16  ;;  %328 = vst [vmem:[#allocation2 + $0xb8] sm:$0xff] %v1865_v16 }
  0x34   : > { %329 = vst [vmem:[#allocation2 + $0x60] sm:$0xff] %v1865_v16  ;;  %330 = vst [vmem:[#allocation2 + $0xf0] sm:$0xff] %v1865_v16 }
  0x35   : > { %331 = vst [vmem:[#allocation2 + $0x8] sm:$0xff] %v1865_v16  ;;  %332 = vst [vmem:[#allocation2 + $0x78] sm:$0xff] %v1865_v16 }
  0x36   : > { %333 = vst [vmem:[#allocation2 + $0x38] sm:$0xff] %v1865_v16  ;;  %334 = vst [vmem:[#allocation2 + $0x58] sm:$0xff] %v1865_v16 }
  0x37   : > { %335 = vst [vmem:[#allocation2 + $0x40] sm:$0xff] %v1865_v16  ;;  %336 = vst [vmem:[#allocation2 + $0xc8] sm:$0xff] %v1865_v16 }
  0x38   : > { %337 = vst [vmem:[#allocation2 + $0xe0] sm:$0xff] %v1865_v16  ;;  %338 = vst [vmem:[#allocation2 + $0x90] sm:$0xff] %v1865_v16 }
  0x39   : > { %339 = vst [vmem:[#allocation2 + $0x70] sm:$0xff] %v1865_v16  ;;  %340 = vst [vmem:[#allocation2 + $0xc0] sm:$0xff] %v1865_v16 }
  0x3a   : > { %341 = vst [vmem:[#allocation2 + $0xa8] sm:$0xff] %v1865_v16  ;;  %342 = vst [vmem:[#allocation2 + $0xd0] sm:$0xff] %v1865_v16 }
  0x3b   : > { %343 = vst [vmem:[#allocation2 + $0x10] sm:$0xff] %v1865_v16  ;;  %344 = vst [vmem:[#allocation2 + $0x28] sm:$0xff] %v1865_v16 }
  0x3c   : > { %345 = vst [vmem:[#allocation2 + $0xa0] sm:$0xff] %v1865_v16  ;;  %346 = vst [vmem:[#allocation2 + $0xf8] sm:$0xff] %v1865_v16 }
  0x3d   : > { %347 = vst [vmem:[#allocation2 + $0x20] sm:$0xff] %v1865_v16  ;;  %348 = vst [vmem:[#allocation2 + $0x98] sm:$0xff] %v1865_v16 }
  0x3e PF: > { %s1424_s10 = sshll.u32 %s1847_s17, 8  ;;  %v1994_v17 = vld [vmem:[%s1989_s18 + $0x8] sm:$0xff]  ;;  %v349_v37 = vld [vmem:[%s1989_s18] sm:$0xff]  ;;  %v352_v43 = vld [vmem:[%s1989_s18 + $0x18] sm:$0xff]  ;;  %p1442_p12 = scmp.ne.s32.totalorder %s1847_s17, 1 }
  0x3f   : > { %v1997_v18 = vld [vmem:[%s1989_s18 + $0x48] sm:$0xff]  ;;  %s398_s11 = sshra.s32 %s1424_s10, 3  ;;  %v366_v19 = vunpack.c.l.s8.bf16 %v1994_v17  ;;  %v357_v38 = vld [vmem:[%s1989_s18 + $0x40] sm:$0xff]  ;;  %v365_v39 = vunpack.c.l.s8.bf16 %v349_v37  ;;  %v368_v41 = vunpack.c.h.s8.bf16 %v1994_v17  ;;  %v360_v44 = vld [vmem:[%s1989_s18 + $0x58] sm:$0xff]  ;;  %v367_v45 = vunpack.c.h.s8.bf16 %v349_v37 }
  0x40   : > { %v382_v20 = vunpack.c.l.s8.bf16 %v1997_v18  ;;  %s1425_s12 = sshll.u32 %s398_s11, 2  ;;  %v381_v40 = vunpack.c.l.s8.bf16 %v357_v38  ;;  %v384_v42 = vunpack.c.h.s8.bf16 %v1997_v18  ;;  %v383_v46 = vunpack.c.h.s8.bf16 %v357_v38  ;;  %v351_v49 = vld [vmem:[%s1989_s18 + $0x10] sm:$0xff]  ;;  %v354_v55 = vld [vmem:[%s1989_s18 + $0x28] sm:$0xff]  ;;  %v353_v61 = vld [vmem:[%s1989_s18 + $0x20] sm:$0xff] }
  0x41   : > { %s2004_s24 = scalar_lea.vmem %s2142_s2, %s1425_s12  ;;  %594 = vmatprep.mubr.bf16.mxu0 %v366_v19  ;;  %v370_v47 = vunpack.c.l.s8.bf16 %v352_v43  ;;  %v386_v48 = vunpack.c.l.s8.bf16 %v360_v44  ;;  %v359_v50 = vld [vmem:[%s1989_s18 + $0x50] sm:$0xff]  ;;  %v369_v51 = vunpack.c.l.s8.bf16 %v351_v49  ;;  %v372_v53 = vunpack.c.h.s8.bf16 %v352_v43  ;;  %v362_v56 = vld [vmem:[%s1989_s18 + $0x68] sm:$0xff]  ;;  %v361_v62 = vld [vmem:[%s1989_s18 + $0x60] sm:$0xff] }
  0x42   : > { %658 = vmatprep.mubr.bf16.mxu1 %v382_v20  ;;  %v1791_v21 = vld [vmem:[%s2004_s24 + $0x78] sm:$0xff]   ;;  %v1793_v23 = vld [vmem:[%s2004_s24 + $0x70] sm:$0xff]   ;;  %v1795_v25 = vld [vmem:[%s2004_s24 + $0x68] sm:$0xff]   ;;  %v385_v52 = vunpack.c.l.s8.bf16 %v359_v50  ;;  %v388_v54 = vunpack.c.h.s8.bf16 %v360_v44  ;;  %v371_v57 = vunpack.c.h.s8.bf16 %v351_v49  ;;  %v387_v58 = vunpack.c.h.s8.bf16 %v359_v50 }
  0x43   : > { %v1792_v22 = vld [vmem:[%s2004_s24 + $0x38] sm:$0xff]   ;;  %1605 = vmatprep.subr.bf16.mxu0 %v1791_v21  ;;  %1717 = vmatprep.subr.bf16.mxu1 %v1791_v21  ;;  %v1794_v24 = vld [vmem:[%s2004_s24 + $0x30] sm:$0xff]   ;;  %v1796_v26 = vld [vmem:[%s2004_s24 + $0x28] sm:$0xff]   ;;  %v374_v59 = vunpack.c.l.s8.bf16 %v354_v55  ;;  %v390_v60 = vunpack.c.l.s8.bf16 %v362_v56  ;;  %v373_v63 = vunpack.c.l.s8.bf16 %v353_v61  ;;  %v389_v0 = vunpack.c.l.s8.bf16 %v361_v62 }
  0x44   : > { %1606 = vmatpush3.bf16.msra.mxu0 %v1792_v22  ;;  %1725 = vmatpush3.bf16.msra.mxu1 %v1792_v22  ;;  %v1797_v27 = vld [vmem:[%s2004_s24 + $0x60] sm:$0xff]   ;;  %v1799_v29 = vld [vmem:[%s2004_s24 + $0x58] sm:$0xff]   ;;  %v1801_v31 = vld [vmem:[%s2004_s24 + $0x50] sm:$0xff]   ;;  %v376_v1 = vunpack.c.h.s8.bf16 %v354_v55  ;;  %v392_v2 = vunpack.c.h.s8.bf16 %v362_v56  ;;  %v375_v5 = vunpack.c.h.s8.bf16 %v353_v61  ;;  %v391_v6 = vunpack.c.h.s8.bf16 %v361_v62 }
  0x45   : > { %1607 = vmatprep.subr.bf16.mxu0 %v1793_v23  ;;  %1718 = vmatprep.subr.bf16.mxu1 %v1793_v23  ;;  %v1798_v28 = vld [vmem:[%s2004_s24 + $0x20] sm:$0xff]   ;;  %v1800_v30 = vld [vmem:[%s2004_s24 + $0x18] sm:$0xff]   ;;  %v1802_v32 = vld [vmem:[%s2004_s24 + $0x10] sm:$0xff]  }
  0x46   : > { %v1803_v33 = vld [vmem:[%s2004_s24 + $0x48] sm:$0xff]   ;;  %v1805_v35 = vld [vmem:[%s2004_s24 + $0x40] sm:$0xff]   ;;  %v356_v3 = vld [vmem:[%s1989_s18 + $0x38] sm:$0xff] }
  0x47   : > { %v1804_v34 = vld [vmem:[%s2004_s24 + $0x8] sm:$0xff]   ;;  %v1806_v36 = vld [vmem:[%s2004_s24] sm:$0xff]   ;;  %v364_v4 = vld [vmem:[%s1989_s18 + $0x78] sm:$0xff]  ;;  %v378_v7 = vunpack.c.l.s8.bf16 %v356_v3  ;;  %v380_v13 = vunpack.c.h.s8.bf16 %v356_v3 }
  0x48   : > { %1608 = vmatpush3.bf16.msra.mxu0 %v1794_v24  ;;  %1726 = vmatpush3.bf16.msra.mxu1 %v1794_v24  ;;  %v394_v8 = vunpack.c.l.s8.bf16 %v364_v4  ;;  %v355_v9 = vld [vmem:[%s1989_s18 + $0x30] sm:$0xff]  ;;  %v396_v14 = vunpack.c.h.s8.bf16 %v364_v4  ;;  %v450_v21 = vld [vmem:[#allocation2 + $0x38] sm:$0xff]  ;;  %v454_v61 = vld [vmem:[#allocation2 + $0xe0] sm:$0xff] }
  0x49   : > { %1609 = vmatprep.subr.bf16.mxu0 %v1795_v25  ;;  %1719 = vmatprep.subr.bf16.mxu1 %v1795_v25  ;;  %v363_v10 = vld [vmem:[%s1989_s18 + $0x70] sm:$0xff]  ;;  %v377_v11 = vunpack.c.l.s8.bf16 %v355_v9  ;;  %v379_v15 = vunpack.c.h.s8.bf16 %v355_v9  ;;  %v437_v49 = vld [vmem:[#allocation2 + $0x18] sm:$0xff] }
  0x4a   : > { %v393_v12 = vunpack.c.l.s8.bf16 %v363_v10  ;;  %v395_v16 = vunpack.c.h.s8.bf16 %v363_v10  ;;  %v434_v19 = vld [vmem:[#allocation2 + $0xb0] sm:$0xff] }
  0x4c   : > { %1610 = vmatpush3.bf16.msra.mxu0 %v1796_v26  ;;  %1727 = vmatpush3.bf16.msra.mxu1 %v1796_v26 }
  0x4d   : > { %1611 = vmatprep.subr.bf16.mxu0 %v1797_v27  ;;  %1720 = vmatprep.subr.bf16.mxu1 %v1797_v27 }
  0x50   : > { %1612 = vmatpush3.bf16.msra.mxu0 %v1798_v28  ;;  %1728 = vmatpush3.bf16.msra.mxu1 %v1798_v28 }
  0x51   : > { %1613 = vmatprep.subr.bf16.mxu0 %v1799_v29  ;;  %1721 = vmatprep.subr.bf16.mxu1 %v1799_v29  ;;  %v435_v29 = vld [vmem:[#allocation2] sm:$0xff] }
  0x54   : > { %1614 = vmatpush3.bf16.msra.mxu0 %v1800_v30  ;;  %1729 = vmatpush3.bf16.msra.mxu1 %v1800_v30 }
  0x55   : > { %1615 = vmatprep.subr.bf16.mxu0 %v1801_v31  ;;  %1722 = vmatprep.subr.bf16.mxu1 %v1801_v31  ;;  %v451_v31 = vld [vmem:[#allocation2 + $0x58] sm:$0xff] }
  0x58   : > { %1616 = vmatpush3.bf16.msra.mxu0 %v1802_v32  ;;  %1730 = vmatpush3.bf16.msra.mxu1 %v1802_v32 }
  0x59   : > { %1617 = vmatprep.subr.bf16.mxu0 %v1803_v33  ;;  %1723 = vmatprep.subr.bf16.mxu1 %v1803_v33 }
  0x5c   : > { %1618 = vmatpush3.bf16.msra.mxu0 %v1804_v34  ;;  %1731 = vmatpush3.bf16.msra.mxu1 %v1804_v34 }
  0x5d   : > { %1619 = vmatprep.subr.bf16.mxu0 %v1805_v35  ;;  %1724 = vmatprep.subr.bf16.mxu1 %v1805_v35 }
  0x60   : > { %1620 = vmatpush3.bf16.msra.mxu0 %v1806_v36  ;;  %1732 = vmatpush3.bf16.msra.mxu1 %v1806_v36 }
  0x63   : > { %595 = vmatmul.mubr.bf16.vlgmr.msra.gmra.mxu0 %v365_v39  ;;  %659 = vmatmul.mubr.bf16.vlgmr.msra.gmra.mxu1 %v381_v40  ;;  %v436_v39 = vld [vmem:[#allocation2 + $0xd8] sm:$0xff] }
  0x64   : > { %602 = vmatprep.mubr.bf16.mxu0 %v368_v41  ;;  %666 = vmatprep.mubr.bf16.mxu1 %v384_v42  ;;  %v452_v41 = vld [vmem:[#allocation2 + $0x40] sm:$0xff] }
  0x6b   : > { %603 = vmatmul.mubr.bf16.gmra.mxu0 %v367_v45  ;;  %667 = vmatmul.mubr.bf16.gmra.mxu1 %v383_v46 }
  0x6c   : > { %610 = vmatprep.mubr.bf16.mxu0 %v370_v47  ;;  %674 = vmatprep.mubr.bf16.mxu1 %v386_v48 }
  0x73   : > { %611 = vmatmul.mubr.bf16.gmra.mxu0 %v369_v51  ;;  %675 = vmatmul.mubr.bf16.gmra.mxu1 %v385_v52  ;;  %v453_v51 = vld [vmem:[#allocation2 + $0xc8] sm:$0xff] }
  0x74   : > { %618 = vmatprep.mubr.bf16.mxu0 %v372_v53  ;;  %682 = vmatprep.mubr.bf16.mxu1 %v388_v54 }
  0x7b   : > { %619 = vmatmul.mubr.bf16.gmra.mxu0 %v371_v57  ;;  %683 = vmatmul.mubr.bf16.gmra.mxu1 %v387_v58 }
  0x7c   : > { %626 = vmatprep.mubr.bf16.mxu0 %v374_v59  ;;  %690 = vmatprep.mubr.bf16.mxu1 %v390_v60  ;;  %v438_v59 = vld [vmem:[#allocation2 + $0x50] sm:$0xff] }
  0x83   : > { %627 = vmatmul.mubr.bf16.gmra.mxu0 %v373_v63  ;;  %691 = vmatmul.mubr.bf16.gmra.mxu1 %v389_v0 }
  0x84   : > { %634 = vmatprep.mubr.bf16.mxu0 %v376_v1  ;;  %698 = vmatprep.mubr.bf16.mxu1 %v392_v2 }
  0x8b   : > { %635 = vmatmul.mubr.bf16.gmra.mxu0 %v375_v5  ;;  %699 = vmatmul.mubr.bf16.gmra.mxu1 %v391_v6  ;;  %v439_v5 = vld [vmem:[#allocation2 + $0x68] sm:$0xff] }
  0x8c   : > { %642 = vmatprep.mubr.bf16.mxu0 %v378_v7  ;;  %706 = vmatprep.mubr.bf16.mxu1 %v394_v8  ;;  %v455_v7 = vld [vmem:[#allocation2 + $0x90] sm:$0xff] }
  0x93   : > { %643 = vmatmul.mubr.bf16.gmra.mxu0 %v377_v11  ;;  %707 = vmatmul.mubr.bf16.gmra.mxu1 %v393_v12 }
  0x94   : > { %650 = vmatprep.mubr.bf16.mxu0 %v380_v13  ;;  %714 = vmatprep.mubr.bf16.mxu1 %v396_v14 }
  0x9b   : > { %651 = vmatmul.mubr.bf16.gmra.mxu0 %v379_v15  ;;  %715 = vmatmul.mubr.bf16.gmra.mxu1 %v395_v16  ;;  %v440_v15 = vld [vmem:[#allocation2 + $0x30] sm:$0xff] }
 0x123   : > { %v1621_v17 = vpop.f32.mrf.mxu0  ;;  %v1669_v18 = vpop.f32.mrf.mxu1 }
 0x125   : > { %v1622_v20 = vpop.f32.mrf.mxu0  ;;  %v1670_v22 = vpop.f32.mrf.mxu1 }
 0x126   : > { %v1623_v23 = vadd.f32 %v1622_v20, %v1621_v17  ;;  %v1671_v24 = vadd.f32 %v1670_v22, %v1669_v18  ;;  %v456_v17 = vld [vmem:[#allocation2 + $0x70] sm:$0xff] }
 0x127   : > { %v1624_v25 = vpop.f32.mrf.mxu0  ;;  %v1672_v26 = vpop.f32.mrf.mxu1 }
 0x128   : > { %v723_v27 = vadd.f32 %v1623_v23, %v434_v19  ;;  %v739_v28 = vadd.f32 %v1671_v24, %v450_v21 }
 0x129   : > { %v1625_v30 = vpop.f32.mrf.mxu0  ;;  %v1673_v32 = vpop.f32.mrf.mxu1 }
 0x12a   : > { %755 = vst [vmem:[#allocation2 + $0xb0] sm:$0xff] %v723_v27  ;;  %771 = vst [vmem:[#allocation2 + $0x38] sm:$0xff] %v739_v28  ;;  %v1626_v33 = vadd.f32 %v1625_v30, %v1624_v25  ;;  %v1674_v34 = vadd.f32 %v1673_v32, %v1672_v26  ;;  %v441_v25 = vld [vmem:[#allocation2 + $0x48] sm:$0xff]  ;;  %v457_v27 = vld [vmem:[#allocation2 + $0xc0] sm:$0xff] }
 0x12b   : > { %v1627_v35 = vpop.f32.mrf.mxu0  ;;  %v1675_v36 = vpop.f32.mrf.mxu1 }
 0x12c   : > { %v724_v37 = vadd.f32 %v1626_v33, %v435_v29  ;;  %v740_v38 = vadd.f32 %v1674_v34, %v451_v31 }
 0x12d   : > { %v1628_v40 = vpop.f32.mrf.mxu0  ;;  %v1676_v42 = vpop.f32.mrf.mxu1 }
 0x12e   : > { %756 = vst [vmem:[#allocation2] sm:$0xff] %v724_v37  ;;  %772 = vst [vmem:[#allocation2 + $0x58] sm:$0xff] %v740_v38  ;;  %v1629_v43 = vadd.f32 %v1628_v40, %v1627_v35  ;;  %v1677_v44 = vadd.f32 %v1676_v42, %v1675_v36  ;;  %v442_v35 = vld [vmem:[#allocation2 + $0x80] sm:$0xff]  ;;  %v458_v37 = vld [vmem:[#allocation2 + $0xa8] sm:$0xff] }
 0x12f   : > { %v1630_v45 = vpop.f32.mrf.mxu0  ;;  %v1678_v46 = vpop.f32.mrf.mxu1 }
 0x130   : > { %v725_v47 = vadd.f32 %v1629_v43, %v436_v39  ;;  %v741_v48 = vadd.f32 %v1677_v44, %v452_v41 }
 0x131   : > { %v1631_v50 = vpop.f32.mrf.mxu0  ;;  %v1679_v52 = vpop.f32.mrf.mxu1 }
 0x132   : > { %757 = vst [vmem:[#allocation2 + $0xd8] sm:$0xff] %v725_v47  ;;  %773 = vst [vmem:[#allocation2 + $0x40] sm:$0xff] %v741_v48  ;;  %v1632_v53 = vadd.f32 %v1631_v50, %v1630_v45  ;;  %v1680_v54 = vadd.f32 %v1679_v52, %v1678_v46  ;;  %v443_v45 = vld [vmem:[#allocation2 + $0x88] sm:$0xff]  ;;  %v459_v47 = vld [vmem:[#allocation2 + $0xd0] sm:$0xff] }
 0x133   : > { %v1633_v55 = vpop.f32.mrf.mxu0  ;;  %v1681_v56 = vpop.f32.mrf.mxu1 }
 0x134   : > { %v726_v57 = vadd.f32 %v1632_v53, %v437_v49  ;;  %v742_v58 = vadd.f32 %v1680_v54, %v453_v51 }
 0x135   : > { %v1634_v60 = vpop.f32.mrf.mxu0  ;;  %v1682_v62 = vpop.f32.mrf.mxu1 }
 0x136   : > { %758 = vst [vmem:[#allocation2 + $0x18] sm:$0xff] %v726_v57  ;;  %774 = vst [vmem:[#allocation2 + $0xc8] sm:$0xff] %v742_v58  ;;  %v1635_v63 = vadd.f32 %v1634_v60, %v1633_v55  ;;  %v1683_v0 = vadd.f32 %v1682_v62, %v1681_v56  ;;  %v444_v55 = vld [vmem:[#allocation2 + $0xe8] sm:$0xff]  ;;  %v460_v57 = vld [vmem:[#allocation2 + $0x10] sm:$0xff] }
 0x137   : > { %v1636_v1 = vpop.f32.mrf.mxu0  ;;  %v1684_v2 = vpop.f32.mrf.mxu1 }
 0x138   : > { %v727_v3 = vadd.f32 %v1635_v63, %v438_v59  ;;  %v743_v4 = vadd.f32 %v1683_v0, %v454_v61 }
 0x139   : > { %v1637_v6 = vpop.f32.mrf.mxu0  ;;  %v1685_v8 = vpop.f32.mrf.mxu1 }
 0x13a   : > { %759 = vst [vmem:[#allocation2 + $0x50] sm:$0xff] %v727_v3  ;;  %775 = vst [vmem:[#allocation2 + $0xe0] sm:$0xff] %v743_v4  ;;  %v1638_v9 = vadd.f32 %v1637_v6, %v1636_v1  ;;  %v1686_v10 = vadd.f32 %v1685_v8, %v1684_v2  ;;  %v445_v1 = vld [vmem:[#allocation2 + $0xb8] sm:$0xff]  ;;  %v461_v3 = vld [vmem:[#allocation2 + $0x28] sm:$0xff] }
 0x13b   : > { %v1639_v11 = vpop.f32.mrf.mxu0  ;;  %v1687_v12 = vpop.f32.mrf.mxu1 }
 0x13c   : > { %v728_v13 = vadd.f32 %v1638_v9, %v439_v5  ;;  %v744_v14 = vadd.f32 %v1686_v10, %v455_v7 }
 0x13d   : > { %v1640_v16 = vpop.f32.mrf.mxu0  ;;  %v1688_v18 = vpop.f32.mrf.mxu1 }
 0x13e   : > { %760 = vst [vmem:[#allocation2 + $0x68] sm:$0xff] %v728_v13  ;;  %776 = vst [vmem:[#allocation2 + $0x90] sm:$0xff] %v744_v14  ;;  %v1641_v19 = vadd.f32 %v1640_v16, %v1639_v11  ;;  %v1689_v20 = vadd.f32 %v1688_v18, %v1687_v12  ;;  %v446_v11 = vld [vmem:[#allocation2 + $0x60] sm:$0xff] }
 0x13f   : > { %v1642_v21 = vpop.f32.mrf.mxu0  ;;  %v1690_v22 = vpop.f32.mrf.mxu1  ;;  %v462_v13 = vld [vmem:[#allocation2 + $0xa0] sm:$0xff] }
 0x140   : > { %v729_v23 = vadd.f32 %v1641_v19, %v440_v15  ;;  %v745_v24 = vadd.f32 %v1689_v20, %v456_v17 }
 0x141   : > { %v1643_v26 = vpop.f32.mrf.mxu0  ;;  %v1691_v28 = vpop.f32.mrf.mxu1 }
 0x142   : > { %761 = vst [vmem:[#allocation2 + $0x30] sm:$0xff] %v729_v23  ;;  %777 = vst [vmem:[#allocation2 + $0x70] sm:$0xff] %v745_v24  ;;  %v1644_v29 = vadd.f32 %v1643_v26, %v1642_v21  ;;  %v1692_v30 = vadd.f32 %v1691_v28, %v1690_v22  ;;  %v447_v21 = vld [vmem:[#allocation2 + $0xf0] sm:$0xff]  ;;  %v463_v23 = vld [vmem:[#allocation2 + $0xf8] sm:$0xff] }
 0x143   : > { %v1645_v31 = vpop.f32.mrf.mxu0  ;;  %v1693_v32 = vpop.f32.mrf.mxu1 }
 0x144   : > { %v730_v33 = vadd.f32 %v1644_v29, %v441_v25  ;;  %v746_v34 = vadd.f32 %v1692_v30, %v457_v27 }
 0x145   : > { %v1646_v36 = vpop.f32.mrf.mxu0  ;;  %v1694_v38 = vpop.f32.mrf.mxu1 }
 0x146   : > { %762 = vst [vmem:[#allocation2 + $0x48] sm:$0xff] %v730_v33  ;;  %778 = vst [vmem:[#allocation2 + $0xc0] sm:$0xff] %v746_v34  ;;  %v1647_v39 = vadd.f32 %v1646_v36, %v1645_v31  ;;  %v1695_v40 = vadd.f32 %v1694_v38, %v1693_v32  ;;  %v448_v31 = vld [vmem:[#allocation2 + $0x8] sm:$0xff]  ;;  %v464_v33 = vld [vmem:[#allocation2 + $0x20] sm:$0xff] }
 0x147   : > { %v1648_v41 = vpop.f32.mrf.mxu0  ;;  %v1696_v42 = vpop.f32.mrf.mxu1 }
 0x148   : > { %v731_v43 = vadd.f32 %v1647_v39, %v442_v35  ;;  %v747_v44 = vadd.f32 %v1695_v40, %v458_v37 }
 0x149   : > { %v1649_v46 = vpop.f32.mrf.mxu0  ;;  %v1697_v48 = vpop.f32.mrf.mxu1 }
 0x14a   : > { %763 = vst [vmem:[#allocation2 + $0x80] sm:$0xff] %v731_v43  ;;  %779 = vst [vmem:[#allocation2 + $0xa8] sm:$0xff] %v747_v44  ;;  %v1650_v49 = vadd.f32 %v1649_v46, %v1648_v41  ;;  %v1698_v50 = vadd.f32 %v1697_v48, %v1696_v42  ;;  %v449_v41 = vld [vmem:[#allocation2 + $0x78] sm:$0xff] }
 0x14b   : > { %v1651_v51 = vpop.f32.mrf.mxu0  ;;  %v1699_v52 = vpop.f32.mrf.mxu1  ;;  %v465_v43 = vld [vmem:[#allocation2 + $0x98] sm:$0xff] }
 0x14c   : > { %v732_v53 = vadd.f32 %v1650_v49, %v443_v45  ;;  %v748_v54 = vadd.f32 %v1698_v50, %v459_v47 }
 0x14d   : > { %v1652_v56 = vpop.f32.mrf.mxu0  ;;  %v1700_v58 = vpop.f32.mrf.mxu1 }
 0x14e   : > { %764 = vst [vmem:[#allocation2 + $0x88] sm:$0xff] %v732_v53  ;;  %780 = vst [vmem:[#allocation2 + $0xd0] sm:$0xff] %v748_v54  ;;  %v1653_v59 = vadd.f32 %v1652_v56, %v1651_v51  ;;  %v1701_v60 = vadd.f32 %v1700_v58, %v1699_v52 }
 0x14f   : > { %v1654_v61 = vpop.f32.mrf.mxu0  ;;  %v1702_v62 = vpop.f32.mrf.mxu1 }
 0x150   : > { %v733_v63 = vadd.f32 %v1653_v59, %v444_v55  ;;  %v749_v0 = vadd.f32 %v1701_v60, %v460_v57 }
 0x151   : > { %v1655_v2 = vpop.f32.mrf.mxu0  ;;  %v1703_v4 = vpop.f32.mrf.mxu1 }
 0x152   : > { %765 = vst [vmem:[#allocation2 + $0xe8] sm:$0xff] %v733_v63  ;;  %781 = vst [vmem:[#allocation2 + $0x10] sm:$0xff] %v749_v0  ;;  %v1656_v5 = vadd.f32 %v1655_v2, %v1654_v61  ;;  %v1704_v6 = vadd.f32 %v1703_v4, %v1702_v62 }
 0x153   : > { %v1657_v7 = vpop.f32.mrf.mxu0  ;;  %v1705_v8 = vpop.f32.mrf.mxu1 }
 0x154   : > { %v734_v9 = vadd.f32 %v1656_v5, %v445_v1  ;;  %v750_v10 = vadd.f32 %v1704_v6, %v461_v3 }
 0x155   : > { %v1658_v12 = vpop.f32.mrf.mxu0  ;;  %v1706_v14 = vpop.f32.mrf.mxu1 }
 0x156   : > { %766 = vst [vmem:[#allocation2 + $0xb8] sm:$0xff] %v734_v9  ;;  %782 = vst [vmem:[#allocation2 + $0x28] sm:$0xff] %v750_v10  ;;  %v1659_v15 = vadd.f32 %v1658_v12, %v1657_v7  ;;  %v1707_v16 = vadd.f32 %v1706_v14, %v1705_v8 }
 0x157   : > { %v1660_v17 = vpop.f32.mrf.mxu0  ;;  %v1708_v18 = vpop.f32.mrf.mxu1 }
 0x158   : > { %v735_v19 = vadd.f32 %v1659_v15, %v446_v11  ;;  %v751_v20 = vadd.f32 %v1707_v16, %v462_v13 }
 0x159   : > { %v1661_v22 = vpop.f32.mrf.mxu0  ;;  %v1709_v24 = vpop.f32.mrf.mxu1 }
 0x15a   : > { %767 = vst [vmem:[#allocation2 + $0x60] sm:$0xff] %v735_v19  ;;  %783 = vst [vmem:[#allocation2 + $0xa0] sm:$0xff] %v751_v20  ;;  %v1662_v25 = vadd.f32 %v1661_v22, %v1660_v17  ;;  %v1710_v26 = vadd.f32 %v1709_v24, %v1708_v18 }
 0x15b   : > { %v1663_v27 = vpop.f32.mrf.mxu0  ;;  %v1711_v28 = vpop.f32.mrf.mxu1 }
 0x15c   : > { %v736_v29 = vadd.f32 %v1662_v25, %v447_v21  ;;  %v752_v30 = vadd.f32 %v1710_v26, %v463_v23 }
 0x15d   : > { %v1664_v32 = vpop.f32.mrf.mxu0  ;;  %v1712_v34 = vpop.f32.mrf.mxu1 }
 0x15e   : > { %768 = vst [vmem:[#allocation2 + $0xf0] sm:$0xff] %v736_v29  ;;  %784 = vst [vmem:[#allocation2 + $0xf8] sm:$0xff] %v752_v30  ;;  %v1665_v35 = vadd.f32 %v1664_v32, %v1663_v27  ;;  %v1713_v36 = vadd.f32 %v1712_v34, %v1711_v28 }
 0x15f   : > { %v1666_v37 = vpop.f32.mrf.mxu0  ;;  %v1714_v38 = vpop.f32.mrf.mxu1 }
 0x160   : > { %v737_v39 = vadd.f32 %v1665_v35, %v448_v31  ;;  %v753_v40 = vadd.f32 %v1713_v36, %v464_v33 }
 0x161   : > { %v1667_v42 = vpop.f32.mrf.mxu0  ;;  %v1715_v44 = vpop.f32.mrf.mxu1 }
 0x162   : > { %769 = vst [vmem:[#allocation2 + $0x8] sm:$0xff] %v737_v39  ;;  %785 = vst [vmem:[#allocation2 + $0x20] sm:$0xff] %v753_v40  ;;  %v1668_v45 = vadd.f32 %v1667_v42, %v1666_v37  ;;  %v1716_v46 = vadd.f32 %v1715_v44, %v1714_v38  ;;  %790 = sbr.rel (%p1442_p12) target bundleno = 554 (0x22a), region = 67 }
 0x164   : > { %v738_v47 = vadd.f32 %v1668_v45, %v449_v41  ;;  %v754_v48 = vadd.f32 %v1716_v46, %v465_v43 }
 0x166   : > { %770 = vst [vmem:[#allocation2 + $0x78] sm:$0xff] %v738_v47  ;;  %786 = vst [vmem:[#allocation2 + $0x98] sm:$0xff] %v754_v48 }
 0x167   : > { %v793_v49 = vld [vmem:[%s1977_s30 + $0x10] sm:$0xff]  ;;  %v791_v50 = vld [vmem:[%s1977_s30] sm:$0xff]  ;;  %v1866_v51 = vmov 0   ;;  %v794_v52 = vld [vmem:[%s1977_s30 + $0x18] sm:$0xff] }
 0x168   : > { %1808 = vset.pattern.permute.xlu1 %v1866_v51  ;;  %1807 = vset.pattern.permute.xlu0 %v1866_v51  ;;  %v792_v53 = vld [vmem:[%s1977_s30 + $0x8] sm:$0xff]  ;;  %v795_v55 = vld [vmem:[%s1977_s30 + $0x20] sm:$0xff]  ;;  %v798_v56 = vld [vmem:[%s1977_s30 + $0x38] sm:$0xff] }
 0x169   : > { %867 = vperm.xlu1 %1808, %v793_v49   ;;  %857 = vperm.xlu0 %1807, %v791_v50   ;;  %v796_v54 = vld [vmem:[%s1977_s30 + $0x28] sm:$0xff]  ;;  %v797_v57 = vld [vmem:[%s1977_s30 + $0x30] sm:$0xff]  ;;  %v799_v59 = vld [vmem:[%s1977_s30 + $0x40] sm:$0xff] }
 0x16a   : > { %v800_v58 = vld [vmem:[%s1977_s30 + $0x48] sm:$0xff]  ;;  %v802_v60 = vld [vmem:[%s1977_s30 + $0x58] sm:$0xff]  ;;  %v801_v61 = vld [vmem:[%s1977_s30 + $0x50] sm:$0xff] }
 0x16b   : > { %v804_v62 = vld [vmem:[%s1977_s30 + $0x68] sm:$0xff]  ;;  %v803_v63 = vld [vmem:[%s1977_s30 + $0x60] sm:$0xff]  ;;  %v806_v0 = vld [vmem:[%s1977_s30 + $0x78] sm:$0xff] }
 0x16c   : > { %v805_v1 = vld [vmem:[%s1977_s30 + $0x70] sm:$0xff]  ;;  %v808_v2 = vld [vmem:[%s1977_s30 + $0x88] sm:$0xff]  ;;  %v807_v3 = vld [vmem:[%s1977_s30 + $0x80] sm:$0xff] }
 0x16d   : > { %872 = vperm.xlu1 %1808, %v794_v52   ;;  %862 = vperm.xlu0 %1807, %v792_v53   ;;  %v810_v4 = vld [vmem:[%s1977_s30 + $0x98] sm:$0xff]  ;;  %v809_v5 = vld [vmem:[%s1977_s30 + $0x90] sm:$0xff]  ;;  %v812_v6 = vld [vmem:[%s1977_s30 + $0xa8] sm:$0xff] }
 0x16e   : > { %v811_v7 = vld [vmem:[%s1977_s30 + $0xa0] sm:$0xff]  ;;  %v814_v8 = vld [vmem:[%s1977_s30 + $0xb8] sm:$0xff]  ;;  %v813_v9 = vld [vmem:[%s1977_s30 + $0xb0] sm:$0xff] }
 0x16f   : > { %v816_v10 = vld [vmem:[%s1977_s30 + $0xc8] sm:$0xff]  ;;  %v815_v11 = vld [vmem:[%s1977_s30 + $0xc0] sm:$0xff]  ;;  %v818_v12 = vld [vmem:[%s1977_s30 + $0xd8] sm:$0xff] }
 0x170   : > { %v817_v13 = vld [vmem:[%s1977_s30 + $0xd0] sm:$0xff]  ;;  %v820_v14 = vld [vmem:[%s1977_s30 + $0xe8] sm:$0xff]  ;;  %v819_v15 = vld [vmem:[%s1977_s30 + $0xe0] sm:$0xff] }
 0x171   : > { %882 = vperm.xlu1 %1808, %v796_v54   ;;  %877 = vperm.xlu0 %1807, %v795_v55   ;;  %v822_v16 = vld [vmem:[%s1977_s30 + $0xf8] sm:$0xff]  ;;  %v821_v17 = vld [vmem:[%s1977_s30 + $0xf0] sm:$0xff]  ;;  %v1047_v24 = vld [vmem:[%s1982_s7] sm:$0xff] }
 0x172   : > { %v825_v18 = vld [vmem:[#allocation2 + $0xd8] sm:$0xff]  ;;  %v823_v19 = vld [vmem:[#allocation2 + $0xb0] sm:$0xff]  ;;  %v824_v27 = vld [vmem:[#allocation2] sm:$0xff] }
 0x173   : > { %v1049_v22 = vld [vmem:[%s1982_s7 + $0x10] sm:$0xff]  ;;  %v826_v26 = vld [vmem:[#allocation2 + $0x18] sm:$0xff]  ;;  %v1048_v32 = vld [vmem:[%s1982_s7 + $0x8] sm:$0xff] }
 0x174   : > { %v1050_v30 = vld [vmem:[%s1982_s7 + $0x18] sm:$0xff]  ;;  %v828_v36 = vld [vmem:[#allocation2 + $0x68] sm:$0xff]  ;;  %v827_v37 = vld [vmem:[#allocation2 + $0x50] sm:$0xff] }
 0x175   : > { %892 = vperm.xlu1 %1808, %v798_v56   ;;  %887 = vperm.xlu0 %1807, %v797_v57   ;;  %v1052_v42 = vld [vmem:[%s1982_s7 + $0x28] sm:$0xff]  ;;  %v1051_v44 = vld [vmem:[%s1982_s7 + $0x20] sm:$0xff]  ;;  %v829_v51 = vld [vmem:[#allocation2 + $0x30] sm:$0xff] }
 0x176   : > { %v830_v50 = vld [vmem:[#allocation2 + $0x48] sm:$0xff]  ;;  %v1054_v56 = vld [vmem:[%s1982_s7 + $0x38] sm:$0xff] }
 0x179   : > { %902 = vperm.xlu1 %1808, %v800_v58   ;;  %897 = vperm.xlu0 %1807, %v799_v59   ;;  %v1053_v58 = vld [vmem:[%s1982_s7 + $0x30] sm:$0xff] }
 0x17d   : > { %912 = vperm.xlu1 %1808, %v802_v60   ;;  %907 = vperm.xlu0 %1807, %v801_v61  }
 0x181   : > { %922 = vperm.xlu1 %1808, %v804_v62   ;;  %917 = vperm.xlu0 %1807, %v803_v63  }
 0x185   : > { %932 = vperm.xlu1 %1808, %v806_v0   ;;  %927 = vperm.xlu0 %1807, %v805_v1   ;;  %v832_v0 = vld [vmem:[#allocation2 + $0x88] sm:$0xff]  ;;  %v831_v1 = vld [vmem:[#allocation2 + $0x80] sm:$0xff] }
 0x189   : > { %942 = vperm.xlu1 %1808, %v808_v2   ;;  %937 = vperm.xlu0 %1807, %v807_v3  }
 0x18d   : > { %952 = vperm.xlu1 %1808, %v810_v4   ;;  %947 = vperm.xlu0 %1807, %v809_v5   ;;  %v1056_v5 = vld [vmem:[%s1982_s7 + $0x48] sm:$0xff] }
 0x191   : > { %962 = vperm.xlu1 %1808, %v812_v6   ;;  %957 = vperm.xlu0 %1807, %v811_v7   ;;  %v1055_v7 = vld [vmem:[%s1982_s7 + $0x40] sm:$0xff] }
 0x195   : > { %972 = vperm.xlu1 %1808, %v814_v8   ;;  %967 = vperm.xlu0 %1807, %v813_v9  }
 0x199   : > { %982 = vperm.xlu1 %1808, %v816_v10   ;;  %977 = vperm.xlu0 %1807, %v815_v11  }
 0x19d   : > { %992 = vperm.xlu1 %1808, %v818_v12   ;;  %987 = vperm.xlu0 %1807, %v817_v13   ;;  %v834_v13 = vld [vmem:[#allocation2 + $0xb8] sm:$0xff] }
 0x1a1   : > { %1002 = vperm.xlu1 %1808, %v820_v14   ;;  %997 = vperm.xlu0 %1807, %v819_v15   ;;  %v833_v14 = vld [vmem:[#allocation2 + $0xe8] sm:$0xff] }
 0x1a5   : > { %1012 = vperm.xlu1 %1808, %v822_v16   ;;  %1007 = vperm.xlu0 %1807, %v821_v17  }
 0x1e4   : > { %v868_v20 = vpop.permute.xlu1 %867  ;;  %v858_v21 = vpop.permute.xlu0 %857 }
 0x1e5   : > { %v1017_v23 = vmul.f32 %v868_v20, %v825_v18  ;;  %v1015_v25 = vmul.f32 %v858_v21, %v823_v19  ;;  %v1058_v18 = vld [vmem:[%s1982_s7 + $0x58] sm:$0xff]  ;;  %v1057_v20 = vld [vmem:[%s1982_s7 + $0x50] sm:$0xff] }
 0x1e7   : > { %v1081_v28 = vadd.f32 %v1049_v22, %v1017_v23  ;;  %v1079_v29 = vadd.f32 %v1047_v24, %v1015_v25 }
 0x1e8   : > { %v873_v31 = vpop.permute.xlu1 %872  ;;  %v863_v33 = vpop.permute.xlu0 %862 }
 0x1e9   : > { %v1018_v34 = vmul.f32 %v873_v31, %v826_v26  ;;  %v1016_v35 = vmul.f32 %v863_v33, %v824_v27  ;;  %v1113_v40 = vmax.f32 %v1081_v28, 0.0  ;;  %v1111_v41 = vmax.f32 %v1079_v29, 0.0  ;;  %v836_v26 = vld [vmem:[#allocation2 + $0xf0] sm:$0xff]  ;;  %v835_v27 = vld [vmem:[#allocation2 + $0x60] sm:$0xff]  ;;  %v1060_v31 = vld [vmem:[%s1982_s7 + $0x68] sm:$0xff] }
 0x1ea   : > { %v1059_v33 = vld [vmem:[%s1982_s7 + $0x60] sm:$0xff] }
 0x1eb   : > { %v1082_v38 = vadd.f32 %v1050_v30, %v1018_v34  ;;  %v1080_v39 = vadd.f32 %v1048_v32, %v1016_v35 }
 0x1ec   : > { %v883_v43 = vpop.permute.xlu1 %882  ;;  %v878_v45 = vpop.permute.xlu0 %877 }
 0x1ed   : > { %v1114_v46 = vmax.f32 %v1082_v38, 0.0  ;;  %v1112_v47 = vmax.f32 %v1080_v39, 0.0  ;;  %v1020_v48 = vmul.f32 %v883_v43, %v828_v36  ;;  %v1019_v49 = vmul.f32 %v878_v45, %v827_v37  ;;  %v838_v39 = vld [vmem:[#allocation2 + $0x78] sm:$0xff] }
 0x1ef   : > { %v1518_v52 = vpack.c.bf16 %v1114_v46, %v1113_v40  ;;  %v1513_v53 = vpack.c.bf16 %v1112_v47, %v1111_v41  ;;  %v1084_v54 = vadd.f32 %v1052_v42, %v1020_v48  ;;  %v1083_v55 = vadd.f32 %v1051_v44, %v1019_v49  ;;  %v837_v40 = vld [vmem:[#allocation2 + $0x8] sm:$0xff]  ;;  %v1062_v44 = vld [vmem:[%s1982_s7 + $0x78] sm:$0xff]  ;;  %v1061_v46 = vld [vmem:[%s1982_s7 + $0x70] sm:$0xff] }
 0x1f0   : > { %v893_v57 = vpop.permute.xlu1 %892  ;;  %v888_v59 = vpop.permute.xlu0 %887 }
 0x1f1   : > { %1590 = vst [vmem:[%s1987_s15 + $0x8] sm:$0xff] %v1518_v52   ;;  %1514 = vst [vmem:[%s1987_s15] sm:$0xff] %v1513_v53   ;;  %v1116_v60 = vmax.f32 %v1084_v54, 0.0  ;;  %v1115_v61 = vmax.f32 %v1083_v55, 0.0  ;;  %v1022_v62 = vmul.f32 %v893_v57, %v830_v50  ;;  %v1021_v63 = vmul.f32 %v888_v59, %v829_v51  ;;  %v840_v52 = vld [vmem:[#allocation2 + $0x58] sm:$0xff]  ;;  %v1064_v57 = vld [vmem:[%s1982_s7 + $0x88] sm:$0xff] }
 0x1f2   : > { %v839_v53 = vld [vmem:[#allocation2 + $0x38] sm:$0xff]  ;;  %v1063_v59 = vld [vmem:[%s1982_s7 + $0x80] sm:$0xff] }
 0x1f3   : > { %v1523_v2 = vpack.c.bf16 %v1116_v60, %v1115_v61  ;;  %v1086_v3 = vadd.f32 %v1054_v56, %v1022_v62  ;;  %v1085_v4 = vadd.f32 %v1053_v58, %v1021_v63 }
 0x1f4   : > { %v903_v6 = vpop.permute.xlu1 %902  ;;  %v898_v8 = vpop.permute.xlu0 %897 }
 0x1f5   : > { %1591 = vst [vmem:[%s1987_s15 + $0x10] sm:$0xff] %v1523_v2   ;;  %v1118_v9 = vmax.f32 %v1086_v3, 0.0  ;;  %v1117_v10 = vmax.f32 %v1085_v4, 0.0  ;;  %v1024_v11 = vmul.f32 %v903_v6, %v832_v0  ;;  %v1023_v12 = vmul.f32 %v898_v8, %v831_v1  ;;  %v842_v1 = vld [vmem:[#allocation2 + $0xc8] sm:$0xff]  ;;  %v841_v2 = vld [vmem:[#allocation2 + $0x40] sm:$0xff]  ;;  %v1066_v6 = vld [vmem:[%s1982_s7 + $0x98] sm:$0xff] }
 0x1f6   : > { %v1065_v8 = vld [vmem:[%s1982_s7 + $0x90] sm:$0xff] }
 0x1f7   : > { %v1528_v15 = vpack.c.bf16 %v1118_v9, %v1117_v10  ;;  %v1088_v16 = vadd.f32 %v1056_v5, %v1024_v11  ;;  %v1087_v17 = vadd.f32 %v1055_v7, %v1023_v12 }
 0x1f8   : > { %v913_v19 = vpop.permute.xlu1 %912  ;;  %v908_v21 = vpop.permute.xlu0 %907 }
 0x1f9   : > { %1592 = vst [vmem:[%s1987_s15 + $0x18] sm:$0xff] %v1528_v15   ;;  %v1120_v22 = vmax.f32 %v1088_v16, 0.0  ;;  %v1119_v23 = vmax.f32 %v1087_v17, 0.0  ;;  %v1026_v24 = vmul.f32 %v913_v19, %v834_v13  ;;  %v1025_v25 = vmul.f32 %v908_v21, %v833_v14  ;;  %v844_v14 = vld [vmem:[#allocation2 + $0x90] sm:$0xff]  ;;  %v843_v15 = vld [vmem:[#allocation2 + $0xe0] sm:$0xff]  ;;  %v1068_v19 = vld [vmem:[%s1982_s7 + $0xa8] sm:$0xff] }
 0x1fa   : > { %v1067_v21 = vld [vmem:[%s1982_s7 + $0xa0] sm:$0xff] }
 0x1fb   : > { %v1533_v28 = vpack.c.bf16 %v1120_v22, %v1119_v23  ;;  %v1090_v29 = vadd.f32 %v1058_v18, %v1026_v24  ;;  %v1089_v30 = vadd.f32 %v1057_v20, %v1025_v25 }
 0x1fc   : > { %v923_v32 = vpop.permute.xlu1 %922  ;;  %v918_v34 = vpop.permute.xlu0 %917 }
 0x1fd   : > { %1593 = vst [vmem:[%s1987_s15 + $0x20] sm:$0xff] %v1533_v28   ;;  %v1122_v35 = vmax.f32 %v1090_v29, 0.0  ;;  %v1121_v36 = vmax.f32 %v1089_v30, 0.0  ;;  %v1028_v37 = vmul.f32 %v923_v32, %v836_v26  ;;  %v1027_v38 = vmul.f32 %v918_v34, %v835_v27  ;;  %v846_v27 = vld [vmem:[#allocation2 + $0xc0] sm:$0xff]  ;;  %v845_v28 = vld [vmem:[#allocation2 + $0x70] sm:$0xff]  ;;  %v1070_v32 = vld [vmem:[%s1982_s7 + $0xb8] sm:$0xff] }
 0x1fe   : > { %v1069_v34 = vld [vmem:[%s1982_s7 + $0xb0] sm:$0xff] }
 0x1ff   : > { %v1538_v41 = vpack.c.bf16 %v1122_v35, %v1121_v36  ;;  %v1092_v42 = vadd.f32 %v1060_v31, %v1028_v37  ;;  %v1091_v43 = vadd.f32 %v1059_v33, %v1027_v38 }
 0x200   : > { %v933_v45 = vpop.permute.xlu1 %932  ;;  %v928_v47 = vpop.permute.xlu0 %927 }
 0x201   : > { %1594 = vst [vmem:[%s1987_s15 + $0x28] sm:$0xff] %v1538_v41   ;;  %v1124_v48 = vmax.f32 %v1092_v42, 0.0  ;;  %v1123_v49 = vmax.f32 %v1091_v43, 0.0  ;;  %v1030_v50 = vmul.f32 %v933_v45, %v838_v39  ;;  %v1029_v51 = vmul.f32 %v928_v47, %v837_v40  ;;  %v848_v40 = vld [vmem:[#allocation2 + $0xd0] sm:$0xff]  ;;  %v847_v41 = vld [vmem:[#allocation2 + $0xa8] sm:$0xff]  ;;  %v1071_v47 = vld [vmem:[%s1982_s7 + $0xc0] sm:$0xff] }
 0x202   : > { %v1072_v45 = vld [vmem:[%s1982_s7 + $0xc8] sm:$0xff] }
 0x203   : > { %v1543_v54 = vpack.c.bf16 %v1124_v48, %v1123_v49  ;;  %v1094_v55 = vadd.f32 %v1062_v44, %v1030_v50  ;;  %v1093_v56 = vadd.f32 %v1061_v46, %v1029_v51 }
 0x204   : > { %v943_v58 = vpop.permute.xlu1 %942  ;;  %v938_v60 = vpop.permute.xlu0 %937 }
 0x205   : > { %1595 = vst [vmem:[%s1987_s15 + $0x30] sm:$0xff] %v1543_v54   ;;  %v1126_v61 = vmax.f32 %v1094_v55, 0.0  ;;  %v1125_v62 = vmax.f32 %v1093_v56, 0.0  ;;  %v1032_v63 = vmul.f32 %v943_v58, %v840_v52  ;;  %v1031_v0 = vmul.f32 %v938_v60, %v839_v53  ;;  %v850_v53 = vld [vmem:[#allocation2 + $0x28] sm:$0xff]  ;;  %v849_v54 = vld [vmem:[#allocation2 + $0x10] sm:$0xff]  ;;  %v1074_v58 = vld [vmem:[%s1982_s7 + $0xd8] sm:$0xff] }
 0x206   : > { %v1073_v60 = vld [vmem:[%s1982_s7 + $0xd0] sm:$0xff] }
 0x207   : > { %v1548_v3 = vpack.c.bf16 %v1126_v61, %v1125_v62  ;;  %v1096_v4 = vadd.f32 %v1064_v57, %v1032_v63  ;;  %v1095_v5 = vadd.f32 %v1063_v59, %v1031_v0 }
 0x208   : > { %v953_v7 = vpop.permute.xlu1 %952  ;;  %v948_v9 = vpop.permute.xlu0 %947 }
 0x209   : > { %1596 = vst [vmem:[%s1987_s15 + $0x38] sm:$0xff] %v1548_v3   ;;  %v1128_v10 = vmax.f32 %v1096_v4, 0.0  ;;  %v1127_v11 = vmax.f32 %v1095_v5, 0.0  ;;  %v1034_v12 = vmul.f32 %v953_v7, %v842_v1  ;;  %v1033_v13 = vmul.f32 %v948_v9, %v841_v2  ;;  %v852_v2 = vld [vmem:[#allocation2 + $0xf8] sm:$0xff]  ;;  %v851_v3 = vld [vmem:[#allocation2 + $0xa0] sm:$0xff]  ;;  %v1076_v7 = vld [vmem:[%s1982_s7 + $0xe8] sm:$0xff] }
 0x20a   : > { %v1075_v9 = vld [vmem:[%s1982_s7 + $0xe0] sm:$0xff] }
 0x20b   : > { %v1553_v16 = vpack.c.bf16 %v1128_v10, %v1127_v11  ;;  %v1098_v17 = vadd.f32 %v1066_v6, %v1034_v12  ;;  %v1097_v18 = vadd.f32 %v1065_v8, %v1033_v13 }
 0x20c   : > { %v963_v20 = vpop.permute.xlu1 %962  ;;  %v958_v22 = vpop.permute.xlu0 %957 }
 0x20d   : > { %1597 = vst [vmem:[%s1987_s15 + $0x40] sm:$0xff] %v1553_v16   ;;  %v1130_v23 = vmax.f32 %v1098_v17, 0.0  ;;  %v1129_v24 = vmax.f32 %v1097_v18, 0.0  ;;  %v1036_v25 = vmul.f32 %v963_v20, %v844_v14  ;;  %v1035_v26 = vmul.f32 %v958_v22, %v843_v15  ;;  %v854_v15 = vld [vmem:[#allocation2 + $0x98] sm:$0xff]  ;;  %v853_v16 = vld [vmem:[#allocation2 + $0x20] sm:$0xff]  ;;  %v1077_v22 = vld [vmem:[%s1982_s7 + $0xf0] sm:$0xff] }
 0x20e   : > { %v1078_v20 = vld [vmem:[%s1982_s7 + $0xf8] sm:$0xff] }
 0x20f   : > { %v1558_v29 = vpack.c.bf16 %v1130_v23, %v1129_v24  ;;  %v1100_v30 = vadd.f32 %v1068_v19, %v1036_v25  ;;  %v1099_v31 = vadd.f32 %v1067_v21, %v1035_v26 }
 0x210   : > { %v973_v33 = vpop.permute.xlu1 %972  ;;  %v968_v35 = vpop.permute.xlu0 %967 }
 0x211   : > { %1598 = vst [vmem:[%s1987_s15 + $0x48] sm:$0xff] %v1558_v29   ;;  %v1132_v36 = vmax.f32 %v1100_v30, 0.0  ;;  %v1131_v37 = vmax.f32 %v1099_v31, 0.0  ;;  %v1038_v38 = vmul.f32 %v973_v33, %v846_v27  ;;  %v1037_v39 = vmul.f32 %v968_v35, %v845_v28 }
 0x213   : > { %v1563_v42 = vpack.c.bf16 %v1132_v36, %v1131_v37  ;;  %v1102_v43 = vadd.f32 %v1070_v32, %v1038_v38  ;;  %v1101_v44 = vadd.f32 %v1069_v34, %v1037_v39 }
 0x214   : > { %v983_v46 = vpop.permute.xlu1 %982  ;;  %v978_v48 = vpop.permute.xlu0 %977 }
 0x215   : > { %1599 = vst [vmem:[%s1987_s15 + $0x50] sm:$0xff] %v1563_v42   ;;  %v1134_v49 = vmax.f32 %v1102_v43, 0.0  ;;  %v1133_v50 = vmax.f32 %v1101_v44, 0.0  ;;  %v1040_v51 = vmul.f32 %v983_v46, %v848_v40  ;;  %v1039_v52 = vmul.f32 %v978_v48, %v847_v41 }
 0x217   : > { %v1568_v55 = vpack.c.bf16 %v1134_v49, %v1133_v50  ;;  %v1104_v56 = vadd.f32 %v1072_v45, %v1040_v51  ;;  %v1103_v57 = vadd.f32 %v1071_v47, %v1039_v52 }
 0x218   : > { %v993_v59 = vpop.permute.xlu1 %992  ;;  %v988_v61 = vpop.permute.xlu0 %987 }
 0x219   : > { %1600 = vst [vmem:[%s1987_s15 + $0x58] sm:$0xff] %v1568_v55   ;;  %v1136_v62 = vmax.f32 %v1104_v56, 0.0  ;;  %v1135_v63 = vmax.f32 %v1103_v57, 0.0  ;;  %v1042_v0 = vmul.f32 %v993_v59, %v850_v53  ;;  %v1041_v1 = vmul.f32 %v988_v61, %v849_v54 }
 0x21b   : > { %v1573_v4 = vpack.c.bf16 %v1136_v62, %v1135_v63  ;;  %v1106_v5 = vadd.f32 %v1074_v58, %v1042_v0  ;;  %v1105_v6 = vadd.f32 %v1073_v60, %v1041_v1 }
 0x21c   : > { %v1003_v8 = vpop.permute.xlu1 %1002  ;;  %v998_v10 = vpop.permute.xlu0 %997 }
 0x21d   : > { %1601 = vst [vmem:[%s1987_s15 + $0x60] sm:$0xff] %v1573_v4   ;;  %v1138_v11 = vmax.f32 %v1106_v5, 0.0  ;;  %v1137_v12 = vmax.f32 %v1105_v6, 0.0  ;;  %v1044_v13 = vmul.f32 %v1003_v8, %v852_v2  ;;  %v1043_v14 = vmul.f32 %v998_v10, %v851_v3 }
 0x21f   : > { %v1578_v17 = vpack.c.bf16 %v1138_v11, %v1137_v12  ;;  %v1108_v18 = vadd.f32 %v1076_v7, %v1044_v13  ;;  %v1107_v19 = vadd.f32 %v1075_v9, %v1043_v14 }
 0x220   : > { %v1013_v21 = vpop.permute.xlu1 %1012  ;;  %v1008_v23 = vpop.permute.xlu0 %1007 }
 0x221   : > { %1602 = vst [vmem:[%s1987_s15 + $0x68] sm:$0xff] %v1578_v17   ;;  %v1140_v24 = vmax.f32 %v1108_v18, 0.0  ;;  %v1139_v25 = vmax.f32 %v1107_v19, 0.0  ;;  %v1046_v26 = vmul.f32 %v1013_v21, %v854_v15  ;;  %v1045_v27 = vmul.f32 %v1008_v23, %v853_v16 }
 0x223   : > { %v1583_v28 = vpack.c.bf16 %v1140_v24, %v1139_v25  ;;  %v1110_v29 = vadd.f32 %v1078_v20, %v1046_v26  ;;  %v1109_v30 = vadd.f32 %v1077_v22, %v1045_v27 }
 0x225   : > { %1603 = vst [vmem:[%s1987_s15 + $0x70] sm:$0xff] %v1583_v28   ;;  %v1142_v31 = vmax.f32 %v1110_v29, 0.0  ;;  %v1141_v32 = vmax.f32 %v1109_v30, 0.0 }
 0x227   : > { %v1588_v33 = vpack.c.bf16 %v1142_v31, %v1141_v32 }
 0x229   : > { %1604 = vst [vmem:[%s1987_s15 + $0x78] sm:$0xff] %v1588_v33  }
 0x22a PF: > { %s14_s21 = sadd.s32 1, %s1863_s21   ;;  %s2145_s15 = smov %s1843_s16 }
 0x22b   : > { %p11_p13 = scmp.ge.s32.totalorder %s14_s21, 6   ;;  %s2146_s16 = smov %s1943_s28 }
 0x22c   : > { %s2147_s17 = smov %s1855_s19  ;;  %s2148_s18 = smov %s1859_s20 }
 0x22d   : > { %s2149_s19 = smov %s2152_s22  ;;  %s2150_s20 = smov %s2156_s23 }
 0x22e   :  { %13 = sbr.rel (!%p11_p13) target bundleno = 4 (0x4), region = 109 }

// kernel: graphsage_forward.6
= control target key start
LH: loop header
LB: loop body
LE: loop exit
PB: predicated region body
PF: predicated region fallthrough
CT: control target
= control target key end

     0   :  { %s1258_s15 = smov 0   ;;  %s1457_s0 = inlined_call_operand.vmem [shape: bf16[512,128], index: 0, kind: input, shape index: {}]   ;;  %s1458_s1 = inlined_call_operand.vmem [shape: bf16[128,256], index: 1, kind: input, shape index: {}]   ;;  %s1459_s2 = inlined_call_operand.vmem [shape: f32[1,128], index: 2, kind: input, shape index: {}]   ;;  %s1460_s3 = inlined_call_operand.vmem [shape: f32[512,128], index: 3, kind: output, shape index: {0}]   ;;  %s1461_s4 = inlined_call_operand.vmem [shape: bf16[512,128], index: 4, kind: output, shape index: {1}]  }
   0x1 LB: > { %s954_s16 = sadd.s32 4294967295, %s1230_s15   ;;  %p958_p0 = scmp.ge.s32.totalorder %s1230_s15, 1  ;;  %s1230_s15 = sphi %s1258_s15, %s15_s15  }
   0x2   : > { %p166_p1 = scmp.lt.s32.totalorder %s1230_s15, 3 }
   0x4   : > { %p167_p2 = pnand %p958_p0, %p166_p1 }
   0x5   : > { %s959_s19 = sshll.u32 (!%p167_p2), %s954_s16, 5 }
   0x6   : > { %170 = sbr.rel (%p167_p2) target bundleno = 303 (0x12f), region = 32  ;;  %p198_p3 = scmp.lt.s32.totalorder (!%p167_p2), %s959_s19, 63 }
   0xb   : > { %v1184_v0 = vld [vmem:[%s1458_s1 + $0x74] ss:$8 sps:$4 sm:$0xff]   ;;  %v1186_v1 = vld [vmem:[%s1458_s1 + $0x70] ss:$8 sps:$4 sm:$0xff]   ;;  %v1232_v2 = vmov 0   ;;  %s1463_s19 = smov (!%p198_p3, %s959_s19), 63 }
   0xc   : > { %472 = vmatprep.mubr.bf16.mxu0 %v1232_v2  ;;  %552 = vmatprep.mubr.bf16.mxu1 %v1232_v2  ;;  %v1187_v3 = vld [vmem:[%s1458_s1 + $0x64] ss:$8 sps:$4 sm:$0xff]   ;;  %v1189_v4 = vld [vmem:[%s1458_s1 + $0x60] ss:$8 sps:$4 sm:$0xff]   ;;  %v1190_v5 = vld [vmem:[%s1458_s1 + $0x54] ss:$8 sps:$4 sm:$0xff]  }
   0xd   : > { %440 = vmatprep.subr.bf16.mxu0 %v1184_v0  ;;  %1159 = vmatprep.subr.bf16.mxu1 %v1184_v0  ;;  %s960_s28 = sshll.u32 %s1463_s19, 2  ;;  %v1192_v6 = vld [vmem:[%s1458_s1 + $0x50] ss:$8 sps:$4 sm:$0xff]   ;;  %v1193_v7 = vld [vmem:[%s1458_s1 + $0x44] ss:$8 sps:$4 sm:$0xff]   ;;  %s962_s5 = sshll.u32 %s1463_s19, 3 }
   0xe   : > { %441 = vmatpush1.bf16.msra.mxu0 %v1186_v1  ;;  %1167 = vmatpush1.bf16.msra.mxu1 %v1186_v1  ;;  %s1297_s9 = scalar_lea.vmem %s1457_s0, %s960_s28  ;;  %v1195_v8 = vld [vmem:[%s1458_s1 + $0x40] ss:$8 sps:$4 sm:$0xff]   ;;  %v1196_v9 = vld [vmem:[%s1458_s1 + $0x34] ss:$8 sps:$4 sm:$0xff]   ;;  %v1198_v10 = vld [vmem:[%s1458_s1 + $0x30] ss:$8 sps:$4 sm:$0xff]   ;;  %s1365_s11 = scalar_lea.vmem %s1460_s3, %s962_s5 }
   0xf   : > { %442 = vmatprep.subr.bf16.mxu0 %v1187_v3  ;;  %1160 = vmatprep.subr.bf16.mxu1 %v1187_v3  ;;  %v1199_v11 = vld [vmem:[%s1458_s1 + $0x24] ss:$8 sps:$4 sm:$0xff]   ;;  %v1201_v12 = vld [vmem:[%s1458_s1 + $0x20] ss:$8 sps:$4 sm:$0xff]   ;;  %v1202_v13 = vld [vmem:[%s1458_s1 + $0x14] ss:$8 sps:$4 sm:$0xff]   ;;  %s1378_s13 = scalar_lea.vmem %s1461_s4, %s960_s28 }
  0x10   : > { %v1204_v14 = vld [vmem:[%s1458_s1 + $0x10] ss:$8 sps:$4 sm:$0xff]   ;;  %v1205_v15 = vld [vmem:[%s1458_s1 + $0x4] ss:$8 sps:$4 sm:$0xff]   ;;  %v1207_v16 = vld [vmem:[%s1458_s1] ss:$8 sps:$4 sm:$0xff]  }
  0x11   : > { %v1208_v17 = vld [vmem:[%s1297_s9] sm:$0xff]   ;;  %v1210_v19 = vld [vmem:[%s1297_s9 + $0x8] sm:$0xff]   ;;  %v1212_v21 = vld [vmem:[%s1297_s9 + $0x10] sm:$0xff]  }
  0x12   : > { %443 = vmatpush1.bf16.msra.mxu0 %v1189_v4  ;;  %1168 = vmatpush1.bf16.msra.mxu1 %v1189_v4  ;;  %v1209_v18 = vld [vmem:[%s1297_s9 + $0x40] sm:$0xff]   ;;  %v1211_v20 = vld [vmem:[%s1297_s9 + $0x48] sm:$0xff]   ;;  %v1213_v22 = vld [vmem:[%s1297_s9 + $0x50] sm:$0xff]  }
  0x13   : > { %444 = vmatprep.subr.bf16.mxu0 %v1190_v5  ;;  %1161 = vmatprep.subr.bf16.mxu1 %v1190_v5  ;;  %v1214_v23 = vld [vmem:[%s1297_s9 + $0x18] sm:$0xff]   ;;  %v1216_v25 = vld [vmem:[%s1297_s9 + $0x20] sm:$0xff]   ;;  %v1218_v27 = vld [vmem:[%s1297_s9 + $0x28] sm:$0xff]  }
  0x14   : > { %v1215_v24 = vld [vmem:[%s1297_s9 + $0x58] sm:$0xff]   ;;  %v1217_v26 = vld [vmem:[%s1297_s9 + $0x60] sm:$0xff]   ;;  %v1219_v28 = vld [vmem:[%s1297_s9 + $0x68] sm:$0xff]  }
  0x15   : > { %v1220_v29 = vld [vmem:[%s1297_s9 + $0x30] sm:$0xff]   ;;  %v1222_v31 = vld [vmem:[%s1297_s9 + $0x38] sm:$0xff]   ;;  %v1360_v33 = vld [vmem:[%s1459_s2] ss:$0 sm:$0xff] }
  0x16   : > { %445 = vmatpush1.bf16.msra.mxu0 %v1192_v6  ;;  %1169 = vmatpush1.bf16.msra.mxu1 %v1192_v6  ;;  %v1221_v30 = vld [vmem:[%s1297_s9 + $0x70] sm:$0xff]   ;;  %v1223_v32 = vld [vmem:[%s1297_s9 + $0x78] sm:$0xff]  }
  0x17   : > { %446 = vmatprep.subr.bf16.mxu0 %v1193_v7  ;;  %1162 = vmatprep.subr.bf16.mxu1 %v1193_v7 }
  0x1a   : > { %447 = vmatpush1.bf16.msra.mxu0 %v1195_v8  ;;  %1170 = vmatpush1.bf16.msra.mxu1 %v1195_v8 }
  0x1b   : > { %448 = vmatprep.subr.bf16.mxu0 %v1196_v9  ;;  %1163 = vmatprep.subr.bf16.mxu1 %v1196_v9 }
  0x1e   : > { %449 = vmatpush1.bf16.msra.mxu0 %v1198_v10  ;;  %1171 = vmatpush1.bf16.msra.mxu1 %v1198_v10 }
  0x1f   : > { %450 = vmatprep.subr.bf16.mxu0 %v1199_v11  ;;  %1164 = vmatprep.subr.bf16.mxu1 %v1199_v11 }
  0x22   : > { %451 = vmatpush1.bf16.msra.mxu0 %v1201_v12  ;;  %1172 = vmatpush1.bf16.msra.mxu1 %v1201_v12 }
  0x23   : > { %452 = vmatprep.subr.bf16.mxu0 %v1202_v13  ;;  %1165 = vmatprep.subr.bf16.mxu1 %v1202_v13 }
  0x26   : > { %453 = vmatpush1.bf16.msra.mxu0 %v1204_v14  ;;  %1173 = vmatpush1.bf16.msra.mxu1 %v1204_v14 }
  0x27   : > { %454 = vmatprep.subr.bf16.mxu0 %v1205_v15  ;;  %1166 = vmatprep.subr.bf16.mxu1 %v1205_v15 }
  0x2a   : > { %455 = vmatpush1.bf16.msra.mxu0 %v1207_v16  ;;  %1174 = vmatpush1.bf16.msra.mxu1 %v1207_v16 }
  0x2d   : > { %473 = vmatmul.mubr.bf16.vlgmr.msra.gmra.mxu0 %v1208_v17  ;;  %553 = vmatmul.mubr.bf16.vlgmr.msra.gmra.mxu1 %v1209_v18 }
  0x2e   : > { %482 = vmatprep.mubr.bf16.mxu0 %v1232_v2  ;;  %562 = vmatprep.mubr.bf16.mxu1 %v1232_v2 }
  0x35   : > { %483 = vmatmul.mubr.bf16.gmra.mxu0 %v1210_v19  ;;  %563 = vmatmul.mubr.bf16.gmra.mxu1 %v1211_v20 }
  0x36   : > { %492 = vmatprep.mubr.bf16.mxu0 %v1232_v2  ;;  %572 = vmatprep.mubr.bf16.mxu1 %v1232_v2 }
  0x3d   : > { %493 = vmatmul.mubr.bf16.gmra.mxu0 %v1212_v21  ;;  %573 = vmatmul.mubr.bf16.gmra.mxu1 %v1213_v22 }
  0x3e   : > { %502 = vmatprep.mubr.bf16.mxu0 %v1232_v2  ;;  %582 = vmatprep.mubr.bf16.mxu1 %v1232_v2 }
  0x45   : > { %503 = vmatmul.mubr.bf16.gmra.mxu0 %v1214_v23  ;;  %583 = vmatmul.mubr.bf16.gmra.mxu1 %v1215_v24 }
  0x46   : > { %512 = vmatprep.mubr.bf16.mxu0 %v1232_v2  ;;  %592 = vmatprep.mubr.bf16.mxu1 %v1232_v2 }
  0x4d   : > { %513 = vmatmul.mubr.bf16.gmra.mxu0 %v1216_v25  ;;  %593 = vmatmul.mubr.bf16.gmra.mxu1 %v1217_v26 }
  0x4e   : > { %522 = vmatprep.mubr.bf16.mxu0 %v1232_v2  ;;  %602 = vmatprep.mubr.bf16.mxu1 %v1232_v2 }
  0x55   : > { %523 = vmatmul.mubr.bf16.gmra.mxu0 %v1218_v27  ;;  %603 = vmatmul.mubr.bf16.gmra.mxu1 %v1219_v28 }
  0x56   : > { %532 = vmatprep.mubr.bf16.mxu0 %v1232_v2  ;;  %612 = vmatprep.mubr.bf16.mxu1 %v1232_v2 }
  0x5d   : > { %533 = vmatmul.mubr.bf16.gmra.mxu0 %v1220_v29  ;;  %613 = vmatmul.mubr.bf16.gmra.mxu1 %v1221_v30 }
  0x5e   : > { %542 = vmatprep.mubr.bf16.mxu0 %v1232_v2  ;;  %622 = vmatprep.mubr.bf16.mxu1 %v1232_v2 }
  0x65   : > { %543 = vmatmul.mubr.bf16.gmra.mxu0 %v1222_v31  ;;  %623 = vmatmul.mubr.bf16.gmra.mxu1 %v1223_v32 }
  0xed   : > { %v474_v34 = vpop.f32.mrf.mxu0  ;;  %v554_v35 = vpop.f32.mrf.mxu1 }
  0xee   : > { %v640_v36 = vadd.f32 %v1360_v33, %v474_v34  ;;  %v656_v37 = vadd.f32 %v1360_v33, %v554_v35 }
  0xef   : > { %v476_v38 = vpop.f32.mrf.mxu0  ;;  %v556_v39 = vpop.f32.mrf.mxu1 }
  0xf0   : > { %672 = vst [vmem:[%s1365_s11] sm:$0xff] %v640_v36  ;;  %688 = vst [vmem:[%s1365_s11 + $0x80] sm:$0xff] %v656_v37 }
  0xf1   : > { %v478_v40 = vpop.f32.mrf.mxu0  ;;  %v558_v41 = vpop.f32.mrf.mxu1 }
  0xf2   : > { %v641_v42 = vadd.f32 %v1360_v33, %v478_v40  ;;  %v657_v43 = vadd.f32 %v1360_v33, %v558_v41 }
  0xf3   : > { %v480_v44 = vpop.f32.mrf.mxu0  ;;  %v560_v45 = vpop.f32.mrf.mxu1 }
  0xf4   : > { %673 = vst [vmem:[%s1365_s11 + $0x8] sm:$0xff] %v641_v42  ;;  %689 = vst [vmem:[%s1365_s11 + $0x88] sm:$0xff] %v657_v43  ;;  %v1067_v46 = vpack.c.bf16 %v480_v44, %v476_v38  ;;  %v1107_v47 = vpack.c.bf16 %v560_v45, %v556_v39 }
  0xf5   : > { %v484_v48 = vpop.f32.mrf.mxu0  ;;  %v564_v49 = vpop.f32.mrf.mxu1 }
  0xf6   : > { %1068 = vst [vmem:[%s1378_s13] sm:$0xff] %v1067_v46   ;;  %1151 = vst [vmem:[%s1378_s13 + $0x40] sm:$0xff] %v1107_v47   ;;  %v642_v50 = vadd.f32 %v1360_v33, %v484_v48  ;;  %v658_v51 = vadd.f32 %v1360_v33, %v564_v49 }
  0xf7   : > { %v486_v52 = vpop.f32.mrf.mxu0  ;;  %v566_v53 = vpop.f32.mrf.mxu1 }
  0xf8   : > { %674 = vst [vmem:[%s1365_s11 + $0x10] sm:$0xff] %v642_v50  ;;  %690 = vst [vmem:[%s1365_s11 + $0x90] sm:$0xff] %v658_v51 }
  0xf9   : > { %v488_v54 = vpop.f32.mrf.mxu0  ;;  %v568_v55 = vpop.f32.mrf.mxu1 }
  0xfa   : > { %v643_v56 = vadd.f32 %v1360_v33, %v488_v54  ;;  %v659_v57 = vadd.f32 %v1360_v33, %v568_v55 }
  0xfb   : > { %v490_v58 = vpop.f32.mrf.mxu0  ;;  %v570_v59 = vpop.f32.mrf.mxu1 }
  0xfc   : > { %675 = vst [vmem:[%s1365_s11 + $0x18] sm:$0xff] %v643_v56  ;;  %691 = vst [vmem:[%s1365_s11 + $0x98] sm:$0xff] %v659_v57  ;;  %v1072_v60 = vpack.c.bf16 %v490_v58, %v486_v52  ;;  %v1112_v61 = vpack.c.bf16 %v570_v59, %v566_v53 }
  0xfd   : > { %v494_v62 = vpop.f32.mrf.mxu0  ;;  %v574_v63 = vpop.f32.mrf.mxu1 }
  0xfe   : > { %1144 = vst [vmem:[%s1378_s13 + $0x8] sm:$0xff] %v1072_v60   ;;  %1152 = vst [vmem:[%s1378_s13 + $0x48] sm:$0xff] %v1112_v61   ;;  %v644_v0 = vadd.f32 %v1360_v33, %v494_v62  ;;  %v660_v1 = vadd.f32 %v1360_v33, %v574_v63 }
  0xff   : > { %v496_v2 = vpop.f32.mrf.mxu0  ;;  %v576_v3 = vpop.f32.mrf.mxu1 }
 0x100   : > { %676 = vst [vmem:[%s1365_s11 + $0x20] sm:$0xff] %v644_v0  ;;  %692 = vst [vmem:[%s1365_s11 + $0xa0] sm:$0xff] %v660_v1 }
 0x101   : > { %v498_v4 = vpop.f32.mrf.mxu0  ;;  %v578_v5 = vpop.f32.mrf.mxu1 }
 0x102   : > { %v645_v6 = vadd.f32 %v1360_v33, %v498_v4  ;;  %v661_v7 = vadd.f32 %v1360_v33, %v578_v5 }
 0x103   : > { %v500_v8 = vpop.f32.mrf.mxu0  ;;  %v580_v9 = vpop.f32.mrf.mxu1 }
 0x104   : > { %677 = vst [vmem:[%s1365_s11 + $0x28] sm:$0xff] %v645_v6  ;;  %693 = vst [vmem:[%s1365_s11 + $0xa8] sm:$0xff] %v661_v7  ;;  %v1077_v10 = vpack.c.bf16 %v500_v8, %v496_v2  ;;  %v1117_v11 = vpack.c.bf16 %v580_v9, %v576_v3 }
 0x105   : > { %v504_v12 = vpop.f32.mrf.mxu0  ;;  %v584_v13 = vpop.f32.mrf.mxu1 }
 0x106   : > { %1145 = vst [vmem:[%s1378_s13 + $0x10] sm:$0xff] %v1077_v10   ;;  %1153 = vst [vmem:[%s1378_s13 + $0x50] sm:$0xff] %v1117_v11   ;;  %v646_v14 = vadd.f32 %v1360_v33, %v504_v12  ;;  %v662_v15 = vadd.f32 %v1360_v33, %v584_v13 }
 0x107   : > { %v506_v16 = vpop.f32.mrf.mxu0  ;;  %v586_v17 = vpop.f32.mrf.mxu1 }
 0x108   : > { %678 = vst [vmem:[%s1365_s11 + $0x30] sm:$0xff] %v646_v14  ;;  %694 = vst [vmem:[%s1365_s11 + $0xb0] sm:$0xff] %v662_v15 }
 0x109   : > { %v508_v18 = vpop.f32.mrf.mxu0  ;;  %v588_v19 = vpop.f32.mrf.mxu1 }
 0x10a   : > { %v647_v20 = vadd.f32 %v1360_v33, %v508_v18  ;;  %v663_v21 = vadd.f32 %v1360_v33, %v588_v19 }
 0x10b   : > { %v510_v22 = vpop.f32.mrf.mxu0  ;;  %v590_v23 = vpop.f32.mrf.mxu1 }
 0x10c   : > { %679 = vst [vmem:[%s1365_s11 + $0x38] sm:$0xff] %v647_v20  ;;  %695 = vst [vmem:[%s1365_s11 + $0xb8] sm:$0xff] %v663_v21  ;;  %v1082_v24 = vpack.c.bf16 %v510_v22, %v506_v16  ;;  %v1122_v25 = vpack.c.bf16 %v590_v23, %v586_v17 }
 0x10d   : > { %v514_v26 = vpop.f32.mrf.mxu0  ;;  %v594_v27 = vpop.f32.mrf.mxu1 }
 0x10e   : > { %1146 = vst [vmem:[%s1378_s13 + $0x18] sm:$0xff] %v1082_v24   ;;  %1154 = vst [vmem:[%s1378_s13 + $0x58] sm:$0xff] %v1122_v25   ;;  %v648_v28 = vadd.f32 %v1360_v33, %v514_v26  ;;  %v664_v29 = vadd.f32 %v1360_v33, %v594_v27 }
 0x10f   : > { %v516_v30 = vpop.f32.mrf.mxu0  ;;  %v596_v31 = vpop.f32.mrf.mxu1 }
 0x110   : > { %680 = vst [vmem:[%s1365_s11 + $0x40] sm:$0xff] %v648_v28  ;;  %696 = vst [vmem:[%s1365_s11 + $0xc0] sm:$0xff] %v664_v29 }
 0x111   : > { %v518_v32 = vpop.f32.mrf.mxu0  ;;  %v598_v34 = vpop.f32.mrf.mxu1 }
 0x112   : > { %v649_v35 = vadd.f32 %v1360_v33, %v518_v32  ;;  %v665_v36 = vadd.f32 %v1360_v33, %v598_v34 }
 0x113   : > { %v520_v37 = vpop.f32.mrf.mxu0  ;;  %v600_v38 = vpop.f32.mrf.mxu1 }
 0x114   : > { %681 = vst [vmem:[%s1365_s11 + $0x48] sm:$0xff] %v649_v35  ;;  %697 = vst [vmem:[%s1365_s11 + $0xc8] sm:$0xff] %v665_v36  ;;  %v1087_v39 = vpack.c.bf16 %v520_v37, %v516_v30  ;;  %v1127_v40 = vpack.c.bf16 %v600_v38, %v596_v31 }
 0x115   : > { %v524_v41 = vpop.f32.mrf.mxu0  ;;  %v604_v42 = vpop.f32.mrf.mxu1 }
 0x116   : > { %1147 = vst [vmem:[%s1378_s13 + $0x20] sm:$0xff] %v1087_v39   ;;  %1155 = vst [vmem:[%s1378_s13 + $0x60] sm:$0xff] %v1127_v40   ;;  %v650_v43 = vadd.f32 %v1360_v33, %v524_v41  ;;  %v666_v44 = vadd.f32 %v1360_v33, %v604_v42 }
 0x117   : > { %v526_v45 = vpop.f32.mrf.mxu0  ;;  %v606_v46 = vpop.f32.mrf.mxu1 }
 0x118   : > { %682 = vst [vmem:[%s1365_s11 + $0x50] sm:$0xff] %v650_v43  ;;  %698 = vst [vmem:[%s1365_s11 + $0xd0] sm:$0xff] %v666_v44 }
 0x119   : > { %v528_v47 = vpop.f32.mrf.mxu0  ;;  %v608_v48 = vpop.f32.mrf.mxu1 }
 0x11a   : > { %v651_v49 = vadd.f32 %v1360_v33, %v528_v47  ;;  %v667_v50 = vadd.f32 %v1360_v33, %v608_v48 }
 0x11b   : > { %v530_v51 = vpop.f32.mrf.mxu0  ;;  %v610_v52 = vpop.f32.mrf.mxu1 }
 0x11c   : > { %683 = vst [vmem:[%s1365_s11 + $0x58] sm:$0xff] %v651_v49  ;;  %699 = vst [vmem:[%s1365_s11 + $0xd8] sm:$0xff] %v667_v50  ;;  %v1092_v53 = vpack.c.bf16 %v530_v51, %v526_v45  ;;  %v1132_v54 = vpack.c.bf16 %v610_v52, %v606_v46 }
 0x11d   : > { %v534_v55 = vpop.f32.mrf.mxu0  ;;  %v614_v56 = vpop.f32.mrf.mxu1 }
 0x11e   : > { %1148 = vst [vmem:[%s1378_s13 + $0x28] sm:$0xff] %v1092_v53   ;;  %1156 = vst [vmem:[%s1378_s13 + $0x68] sm:$0xff] %v1132_v54   ;;  %v652_v57 = vadd.f32 %v1360_v33, %v534_v55  ;;  %v668_v58 = vadd.f32 %v1360_v33, %v614_v56 }
 0x11f   : > { %v536_v59 = vpop.f32.mrf.mxu0  ;;  %v616_v60 = vpop.f32.mrf.mxu1 }
 0x120   : > { %684 = vst [vmem:[%s1365_s11 + $0x60] sm:$0xff] %v652_v57  ;;  %700 = vst [vmem:[%s1365_s11 + $0xe0] sm:$0xff] %v668_v58 }
 0x121   : > { %v538_v61 = vpop.f32.mrf.mxu0  ;;  %v618_v62 = vpop.f32.mrf.mxu1 }
 0x122   : > { %v653_v63 = vadd.f32 %v1360_v33, %v538_v61  ;;  %v669_v0 = vadd.f32 %v1360_v33, %v618_v62 }
 0x123   : > { %v540_v1 = vpop.f32.mrf.mxu0  ;;  %v620_v2 = vpop.f32.mrf.mxu1 }
 0x124   : > { %685 = vst [vmem:[%s1365_s11 + $0x68] sm:$0xff] %v653_v63  ;;  %701 = vst [vmem:[%s1365_s11 + $0xe8] sm:$0xff] %v669_v0  ;;  %v1097_v3 = vpack.c.bf16 %v540_v1, %v536_v59  ;;  %v1137_v4 = vpack.c.bf16 %v620_v2, %v616_v60 }
 0x125   : > { %v544_v5 = vpop.f32.mrf.mxu0  ;;  %v624_v6 = vpop.f32.mrf.mxu1 }
 0x126   : > { %1149 = vst [vmem:[%s1378_s13 + $0x30] sm:$0xff] %v1097_v3   ;;  %1157 = vst [vmem:[%s1378_s13 + $0x70] sm:$0xff] %v1137_v4   ;;  %v654_v7 = vadd.f32 %v1360_v33, %v544_v5  ;;  %v670_v8 = vadd.f32 %v1360_v33, %v624_v6 }
 0x127   : > { %v546_v9 = vpop.f32.mrf.mxu0  ;;  %v626_v10 = vpop.f32.mrf.mxu1 }
 0x128   : > { %686 = vst [vmem:[%s1365_s11 + $0x70] sm:$0xff] %v654_v7  ;;  %702 = vst [vmem:[%s1365_s11 + $0xf0] sm:$0xff] %v670_v8 }
 0x129   : > { %v548_v11 = vpop.f32.mrf.mxu0  ;;  %v628_v12 = vpop.f32.mrf.mxu1 }
 0x12a   : > { %v655_v13 = vadd.f32 %v1360_v33, %v548_v11  ;;  %v671_v14 = vadd.f32 %v1360_v33, %v628_v12 }
 0x12b   : > { %v550_v15 = vpop.f32.mrf.mxu0  ;;  %v630_v16 = vpop.f32.mrf.mxu1 }
 0x12c   : > { %687 = vst [vmem:[%s1365_s11 + $0x78] sm:$0xff] %v655_v13  ;;  %703 = vst [vmem:[%s1365_s11 + $0xf8] sm:$0xff] %v671_v14  ;;  %v1102_v17 = vpack.c.bf16 %v550_v15, %v546_v9  ;;  %v1142_v18 = vpack.c.bf16 %v630_v16, %v626_v10 }
 0x12e   : > { %1150 = vst [vmem:[%s1378_s13 + $0x38] sm:$0xff] %v1102_v17   ;;  %1158 = vst [vmem:[%s1378_s13 + $0x78] sm:$0xff] %v1142_v18  }
 0x12f PF: > { %s15_s15 = sadd.s32 1, %s1230_s15  }
 0x130   : > { %p12_p4 = scmp.ge.s32.totalorder %s15_s15, 4  }
 0x132   :  { %14 = sbr.rel (!%p12_p4) target bundleno = 1 (0x1), region = 74 }

// kernel: graphsage_forward.11
= control target key start
LH: loop header
LB: loop body
LE: loop exit
PB: predicated region body
PF: predicated region fallthrough
CT: control target
= control target key end

     0   :  { %s1573_s15 = smov 0   ;;  %s1575_s16 = smov 0   ;;  %s1965_s0 = inlined_call_operand.vmem [shape: f32[512,1], index: 0, kind: input, shape index: {}]   ;;  %s1966_s1 = inlined_call_operand.vmem [shape: s8[512,512], index: 1, kind: input, shape index: {}]   ;;  %s1967_s2 = inlined_call_operand.vmem [shape: bf16[512,128], index: 2, kind: input, shape index: {}]   ;;  %s1968_s3 = inlined_call_operand.vmem [shape: f32[512,128], index: 3, kind: input, shape index: {}]   ;;  %s1969_s4 = inlined_call_operand.vmem [shape: f32[512,128], index: 4, kind: output, shape index: {}]  }
   0x1   :  { %s1577_s17 = smov 0   ;;  %s1579_s18 = smov 0  }
   0x2   :  { %s1581_s19 = smov 0   ;;  %s1583_s20 = smov 0  }
   0x3   :  { %s1585_s21 = smov 0  }
   0x4 LB: > { %s23_s22 = sadd.s32 1, %s1536_s19  ;;  %s26_s23 = sadd.s32 1, %s1540_s20  ;;  %s1544_s21 = sphi %s1585_s21, %s14_s21   ;;  %s1540_s20 = sphi %s1583_s20, %s1975_s20   ;;  %s1536_s19 = sphi %s1581_s19, %s1974_s19   ;;  %s1532_s18 = sphi %s1579_s18, %s1973_s18   ;;  %s1528_s17 = sphi %s1577_s17, %s1972_s17   ;;  %s1524_s16 = sphi %s1575_s16, %s1971_s16   ;;  %s1520_s15 = sphi %s1573_s15, %s1970_s15  }
   0x5   : > { %p24_p0 = scmp.ge.s32.totalorder %s23_s22, 2  ;;  %p68_p1 = scmp.ne.s32.totalorder %s1524_s16, %s1520_s15 }
   0x6   : > { %p69_p2 = scmp.eq.s32.totalorder %s1544_s21, 0  ;;  %s61_s27 = sadd.s32 1, %s1524_s16 }
   0x7   : > { %s1977_s22 = smov (%p24_p0, %s23_s22), 0  ;;  %s1979_s23 = smov (!%p24_p0, %s26_s23), %s1540_s20 }
   0x8   : > { %p70_p3 = por %p69_p2, %p68_p1  ;;  %p28_p4 = scmp.ge.s32.totalorder %s1979_s23, 2 }
   0x9   : > { %s57_s24 = ssub.s32 %s1536_s19, %s1977_s22  ;;  %p1249_p6 = scmp.ge.s32.totalorder %s1544_s21, 4 }
   0xa   : > { %s1981_s23 = smov (%p28_p4, %s1979_s23), 0 }
   0xb   : > { %s56_s25 = ssub.s32 %s1540_s20, %s1981_s23  ;;  %170 = sbr.rel (%p1249_p6) target bundleno = 31 (0x1f), region = 20 }
   0xc   : > { %s58_s26 = sor.u32 %s57_s24, %s56_s25 }
   0xd   : > { %p59_p5 = scmp.eq.s32.totalorder %s58_s26, 0 }
   0xf   : > { %s1624_s28 = scalar_select %p59_p5, %s1524_s16, %s61_s27  }
  0x10   : > { %182 = sbr.rel (!%p70_p3) target bundleno = 31 (0x1f), region = 28  ;;  %s184_s29 = sand.u32 (%p70_p3), 1, %s1524_s16  }
  0x11   : > { %s1252_s30 = sshll.u32 (%p70_p3), %s1536_s19, 1  ;;  %s1250_s5 = sshll.u32 (%p70_p3), %s184_s29, 7 }
  0x12   : > { %s1285_s6 = sshll.u32 (%p70_p3), %s1540_s20, 5  ;;  %s186_s12 = scalar_lea.vmem (%p70_p3), [#allocation2], %s1250_s5 }
  0x13   : > { %s190_s7 = sadd.s32 (%p70_p3), %s1285_s6, %s1252_s30 }
  0x14   : > { %s1254_s8 = sshll.u32 (%p70_p3), %s190_s7, 3 }
  0x15   : > { %s1633_s11 = scalar_lea.vmem %s1966_s1, %s1254_s8 }
  0x16   : > { %v205_v0 = vld [vmem:[%s1633_s11] sm:$0xff]  ;;  %v207_v1 = vld [vmem:[%s1633_s11 + $0x8] sm:$0xff] }
  0x17   : > { %v209_v2 = vld [vmem:[%s1633_s11 + $0x20] sm:$0xff]  ;;  %206 = vst [vmem:[%s186_s12] sm:$0xff] %v205_v0  ;;  %208 = vst [vmem:[%s186_s12 + $0x8] sm:$0xff] %v207_v1  ;;  %v211_v3 = vld [vmem:[%s1633_s11 + $0x28] sm:$0xff] }
  0x18   : > { %210 = vst [vmem:[%s186_s12 + $0x10] sm:$0xff] %v209_v2  ;;  %v213_v4 = vld [vmem:[%s1633_s11 + $0x40] sm:$0xff]  ;;  %v215_v5 = vld [vmem:[%s1633_s11 + $0x48] sm:$0xff]  ;;  %212 = vst [vmem:[%s186_s12 + $0x18] sm:$0xff] %v211_v3 }
  0x19   : > { %214 = vst [vmem:[%s186_s12 + $0x20] sm:$0xff] %v213_v4  ;;  %216 = vst [vmem:[%s186_s12 + $0x28] sm:$0xff] %v215_v5  ;;  %v217_v6 = vld [vmem:[%s1633_s11 + $0x60] sm:$0xff]  ;;  %v219_v7 = vld [vmem:[%s1633_s11 + $0x68] sm:$0xff] }
  0x1a   : > { %v221_v8 = vld [vmem:[%s1633_s11 + $0x80] sm:$0xff]  ;;  %218 = vst [vmem:[%s186_s12 + $0x30] sm:$0xff] %v217_v6  ;;  %220 = vst [vmem:[%s186_s12 + $0x38] sm:$0xff] %v219_v7  ;;  %v223_v9 = vld [vmem:[%s1633_s11 + $0x88] sm:$0xff] }
  0x1b   : > { %222 = vst [vmem:[%s186_s12 + $0x40] sm:$0xff] %v221_v8  ;;  %v225_v10 = vld [vmem:[%s1633_s11 + $0xa0] sm:$0xff]  ;;  %v227_v11 = vld [vmem:[%s1633_s11 + $0xa8] sm:$0xff]  ;;  %224 = vst [vmem:[%s186_s12 + $0x48] sm:$0xff] %v223_v9 }
  0x1c   : > { %226 = vst [vmem:[%s186_s12 + $0x50] sm:$0xff] %v225_v10  ;;  %228 = vst [vmem:[%s186_s12 + $0x58] sm:$0xff] %v227_v11  ;;  %v229_v12 = vld [vmem:[%s1633_s11 + $0xc0] sm:$0xff]  ;;  %v231_v13 = vld [vmem:[%s1633_s11 + $0xc8] sm:$0xff] }
  0x1d   : > { %v233_v14 = vld [vmem:[%s1633_s11 + $0xe0] sm:$0xff]  ;;  %230 = vst [vmem:[%s186_s12 + $0x60] sm:$0xff] %v229_v12  ;;  %232 = vst [vmem:[%s186_s12 + $0x68] sm:$0xff] %v231_v13  ;;  %v235_v15 = vld [vmem:[%s1633_s11 + $0xe8] sm:$0xff] }
  0x1e   : > { %234 = vst [vmem:[%s186_s12 + $0x70] sm:$0xff] %v233_v14  ;;  %236 = vst [vmem:[%s186_s12 + $0x78] sm:$0xff] %v235_v15 }
  0x1f PF: > { %p1255_p7 = scmp.ge.s32.totalorder %s1544_s21, 1  ;;  %p250_p8 = scmp.lt.s32.totalorder %s1544_s21, 5 }
  0x21   : > { %p251_p9 = pnand %p1255_p7, %p250_p8 }
  0x22   : > { %s257_s13 = sand.u32 (!%p251_p9), 1, %s1520_s15   ;;  %s1257_s14 = sshll.u32 (!%p251_p9), %s1532_s18, 5 }
  0x23   : > { %254 = sbr.rel (%p251_p9) target bundleno = 550 (0x226), region = 55  ;;  %s1256_s24 = sshll.u32 (!%p251_p9), %s257_s13, 7 }
  0x24   : > { %p293_p10 = scmp.lt.s32.totalorder (!%p251_p9), %s1257_s14, 63  ;;  %s1670_s15 = scalar_lea.vmem (!%p251_p9), [#allocation2], %s1256_s24 }
  0x25   : > { %p1263_p11 = scmp.ne.s32.totalorder (!%p251_p9), %s1528_s17, 0 }
  0x28   : > { %s1983_s14 = smov (!%p293_p10, %s1257_s14), 63  ;;  %316 = sbr.rel (%p1263_p11) target bundleno = 62 (0x3e), region = 63 }
  0x29   : > { %s1258_s25 = sshll.u32 %s1983_s14, 3 }
  0x2a   : > { %s1658_s29 = scalar_lea.vmem %s1965_s0, %s1258_s25  ;;  %s1663_s6 = scalar_lea.vmem %s1968_s3, %s1258_s25 }
  0x2b   : > { %s1668_s9 = scalar_lea.vmem %s1969_s4, %s1258_s25 }
  0x2d   : > { %v1546_v16 = vmov 0.0  }
  0x2e   : > { %317 = vst [vmem:[%s1668_s9] sm:$0xff] %v1546_v16  ;;  %318 = vst [vmem:[%s1668_s9 + $0x8] sm:$0xff] %v1546_v16 }
  0x2f   : > { %319 = vst [vmem:[%s1668_s9 + $0x10] sm:$0xff] %v1546_v16  ;;  %320 = vst [vmem:[%s1668_s9 + $0x18] sm:$0xff] %v1546_v16 }
  0x30   : > { %321 = vst [vmem:[%s1668_s9 + $0x20] sm:$0xff] %v1546_v16  ;;  %322 = vst [vmem:[%s1668_s9 + $0x28] sm:$0xff] %v1546_v16 }
  0x31   : > { %323 = vst [vmem:[%s1668_s9 + $0x30] sm:$0xff] %v1546_v16  ;;  %324 = vst [vmem:[%s1668_s9 + $0x38] sm:$0xff] %v1546_v16 }
  0x32   : > { %325 = vst [vmem:[%s1668_s9 + $0x40] sm:$0xff] %v1546_v16  ;;  %326 = vst [vmem:[%s1668_s9 + $0x48] sm:$0xff] %v1546_v16 }
  0x33   : > { %327 = vst [vmem:[%s1668_s9 + $0x50] sm:$0xff] %v1546_v16  ;;  %328 = vst [vmem:[%s1668_s9 + $0x58] sm:$0xff] %v1546_v16 }
  0x34   : > { %329 = vst [vmem:[%s1668_s9 + $0x60] sm:$0xff] %v1546_v16  ;;  %330 = vst [vmem:[%s1668_s9 + $0x68] sm:$0xff] %v1546_v16 }
  0x35   : > { %331 = vst [vmem:[%s1668_s9 + $0x70] sm:$0xff] %v1546_v16  ;;  %332 = vst [vmem:[%s1668_s9 + $0x78] sm:$0xff] %v1546_v16 }
  0x36   : > { %333 = vst [vmem:[%s1668_s9 + $0x80] sm:$0xff] %v1546_v16  ;;  %334 = vst [vmem:[%s1668_s9 + $0x88] sm:$0xff] %v1546_v16 }
  0x37   : > { %335 = vst [vmem:[%s1668_s9 + $0x90] sm:$0xff] %v1546_v16  ;;  %336 = vst [vmem:[%s1668_s9 + $0x98] sm:$0xff] %v1546_v16 }
  0x38   : > { %337 = vst [vmem:[%s1668_s9 + $0xa0] sm:$0xff] %v1546_v16  ;;  %338 = vst [vmem:[%s1668_s9 + $0xa8] sm:$0xff] %v1546_v16 }
  0x39   : > { %339 = vst [vmem:[%s1668_s9 + $0xb0] sm:$0xff] %v1546_v16  ;;  %340 = vst [vmem:[%s1668_s9 + $0xb8] sm:$0xff] %v1546_v16 }
  0x3a   : > { %341 = vst [vmem:[%s1668_s9 + $0xc0] sm:$0xff] %v1546_v16  ;;  %342 = vst [vmem:[%s1668_s9 + $0xc8] sm:$0xff] %v1546_v16 }
  0x3b   : > { %343 = vst [vmem:[%s1668_s9 + $0xd0] sm:$0xff] %v1546_v16  ;;  %344 = vst [vmem:[%s1668_s9 + $0xd8] sm:$0xff] %v1546_v16 }
  0x3c   : > { %345 = vst [vmem:[%s1668_s9 + $0xe0] sm:$0xff] %v1546_v16  ;;  %346 = vst [vmem:[%s1668_s9 + $0xe8] sm:$0xff] %v1546_v16 }
  0x3d   : > { %347 = vst [vmem:[%s1668_s9 + $0xf0] sm:$0xff] %v1546_v16  ;;  %348 = vst [vmem:[%s1668_s9 + $0xf8] sm:$0xff] %v1546_v16 }
  0x3e PF: > { %s1264_s18 = sshll.u32 %s1528_s17, 8  ;;  %v1707_v17 = vld [vmem:[%s1670_s15 + $0x8] sm:$0xff]  ;;  %v349_v37 = vld [vmem:[%s1670_s15] sm:$0xff]  ;;  %v352_v43 = vld [vmem:[%s1670_s15 + $0x18] sm:$0xff]  ;;  %p1282_p12 = scmp.ne.s32.totalorder %s1528_s17, 1 }
  0x3f   : > { %v1710_v18 = vld [vmem:[%s1670_s15 + $0x48] sm:$0xff]  ;;  %s398_s10 = sshra.s32 %s1264_s18, 3  ;;  %v366_v19 = vunpack.c.l.s8.bf16 %v1707_v17  ;;  %v357_v38 = vld [vmem:[%s1670_s15 + $0x40] sm:$0xff]  ;;  %v365_v39 = vunpack.c.l.s8.bf16 %v349_v37  ;;  %v368_v41 = vunpack.c.h.s8.bf16 %v1707_v17  ;;  %v360_v44 = vld [vmem:[%s1670_s15 + $0x58] sm:$0xff]  ;;  %v367_v45 = vunpack.c.h.s8.bf16 %v349_v37 }
  0x40   : > { %v382_v20 = vunpack.c.l.s8.bf16 %v1710_v18  ;;  %s1265_s11 = sshll.u32 %s398_s10, 2  ;;  %v381_v40 = vunpack.c.l.s8.bf16 %v357_v38  ;;  %v384_v42 = vunpack.c.h.s8.bf16 %v1710_v18  ;;  %v383_v46 = vunpack.c.h.s8.bf16 %v357_v38  ;;  %v351_v49 = vld [vmem:[%s1670_s15 + $0x10] sm:$0xff]  ;;  %v354_v55 = vld [vmem:[%s1670_s15 + $0x28] sm:$0xff]  ;;  %v353_v61 = vld [vmem:[%s1670_s15 + $0x20] sm:$0xff] }
  0x41   : > { %s1717_s14 = scalar_lea.vmem %s1967_s2, %s1265_s11  ;;  %594 = vmatprep.mubr.bf16.mxu0 %v366_v19  ;;  %v370_v47 = vunpack.c.l.s8.bf16 %v352_v43  ;;  %v386_v48 = vunpack.c.l.s8.bf16 %v360_v44  ;;  %v359_v50 = vld [vmem:[%s1670_s15 + $0x50] sm:$0xff]  ;;  %v369_v51 = vunpack.c.l.s8.bf16 %v351_v49  ;;  %v372_v53 = vunpack.c.h.s8.bf16 %v352_v43  ;;  %v362_v56 = vld [vmem:[%s1670_s15 + $0x68] sm:$0xff]  ;;  %v361_v62 = vld [vmem:[%s1670_s15 + $0x60] sm:$0xff] }
  0x42   : > { %658 = vmatprep.mubr.bf16.mxu1 %v382_v20  ;;  %v1472_v21 = vld [vmem:[%s1717_s14 + $0x78] sm:$0xff]   ;;  %v1474_v23 = vld [vmem:[%s1717_s14 + $0x70] sm:$0xff]   ;;  %v1476_v25 = vld [vmem:[%s1717_s14 + $0x68] sm:$0xff]   ;;  %v385_v52 = vunpack.c.l.s8.bf16 %v359_v50  ;;  %v388_v54 = vunpack.c.h.s8.bf16 %v360_v44  ;;  %v371_v57 = vunpack.c.h.s8.bf16 %v351_v49  ;;  %v387_v58 = vunpack.c.h.s8.bf16 %v359_v50 }
  0x43   : > { %v1473_v22 = vld [vmem:[%s1717_s14 + $0x38] sm:$0xff]   ;;  %1286 = vmatprep.subr.bf16.mxu0 %v1472_v21  ;;  %1398 = vmatprep.subr.bf16.mxu1 %v1472_v21  ;;  %v1475_v24 = vld [vmem:[%s1717_s14 + $0x30] sm:$0xff]   ;;  %v1477_v26 = vld [vmem:[%s1717_s14 + $0x28] sm:$0xff]   ;;  %v374_v59 = vunpack.c.l.s8.bf16 %v354_v55  ;;  %v390_v60 = vunpack.c.l.s8.bf16 %v362_v56  ;;  %v373_v63 = vunpack.c.l.s8.bf16 %v353_v61  ;;  %v389_v0 = vunpack.c.l.s8.bf16 %v361_v62 }
  0x44   : > { %1287 = vmatpush3.bf16.msra.mxu0 %v1473_v22  ;;  %1406 = vmatpush3.bf16.msra.mxu1 %v1473_v22  ;;  %v1478_v27 = vld [vmem:[%s1717_s14 + $0x60] sm:$0xff]   ;;  %v1480_v29 = vld [vmem:[%s1717_s14 + $0x58] sm:$0xff]   ;;  %v1482_v31 = vld [vmem:[%s1717_s14 + $0x50] sm:$0xff]   ;;  %v376_v1 = vunpack.c.h.s8.bf16 %v354_v55  ;;  %v392_v2 = vunpack.c.h.s8.bf16 %v362_v56  ;;  %v375_v5 = vunpack.c.h.s8.bf16 %v353_v61  ;;  %v391_v6 = vunpack.c.h.s8.bf16 %v361_v62 }
  0x45   : > { %1288 = vmatprep.subr.bf16.mxu0 %v1474_v23  ;;  %1399 = vmatprep.subr.bf16.mxu1 %v1474_v23  ;;  %v1479_v28 = vld [vmem:[%s1717_s14 + $0x20] sm:$0xff]   ;;  %v1481_v30 = vld [vmem:[%s1717_s14 + $0x18] sm:$0xff]   ;;  %v1483_v32 = vld [vmem:[%s1717_s14 + $0x10] sm:$0xff]  }
  0x46   : > { %v1484_v33 = vld [vmem:[%s1717_s14 + $0x48] sm:$0xff]   ;;  %v1486_v35 = vld [vmem:[%s1717_s14 + $0x40] sm:$0xff]   ;;  %v356_v3 = vld [vmem:[%s1670_s15 + $0x38] sm:$0xff] }
  0x47   : > { %v1485_v34 = vld [vmem:[%s1717_s14 + $0x8] sm:$0xff]   ;;  %v1487_v36 = vld [vmem:[%s1717_s14] sm:$0xff]   ;;  %v364_v4 = vld [vmem:[%s1670_s15 + $0x78] sm:$0xff]  ;;  %v378_v7 = vunpack.c.l.s8.bf16 %v356_v3  ;;  %v380_v13 = vunpack.c.h.s8.bf16 %v356_v3 }
  0x48   : > { %1289 = vmatpush3.bf16.msra.mxu0 %v1475_v24  ;;  %1407 = vmatpush3.bf16.msra.mxu1 %v1475_v24  ;;  %v394_v8 = vunpack.c.l.s8.bf16 %v364_v4  ;;  %v355_v9 = vld [vmem:[%s1670_s15 + $0x30] sm:$0xff]  ;;  %v396_v14 = vunpack.c.h.s8.bf16 %v364_v4  ;;  %v434_v19 = vld [vmem:[%s1668_s9] sm:$0xff]  ;;  %v437_v49 = vld [vmem:[%s1668_s9 + $0x18] sm:$0xff] }
  0x49   : > { %1290 = vmatprep.subr.bf16.mxu0 %v1476_v25  ;;  %1400 = vmatprep.subr.bf16.mxu1 %v1476_v25  ;;  %v363_v10 = vld [vmem:[%s1670_s15 + $0x70] sm:$0xff]  ;;  %v377_v11 = vunpack.c.l.s8.bf16 %v355_v9  ;;  %v379_v15 = vunpack.c.h.s8.bf16 %v355_v9  ;;  %v450_v21 = vld [vmem:[%s1668_s9 + $0x80] sm:$0xff] }
  0x4a   : > { %v393_v12 = vunpack.c.l.s8.bf16 %v363_v10  ;;  %v395_v16 = vunpack.c.h.s8.bf16 %v363_v10  ;;  %v454_v61 = vld [vmem:[%s1668_s9 + $0xa0] sm:$0xff] }
  0x4c   : > { %1291 = vmatpush3.bf16.msra.mxu0 %v1477_v26  ;;  %1408 = vmatpush3.bf16.msra.mxu1 %v1477_v26 }
  0x4d   : > { %1292 = vmatprep.subr.bf16.mxu0 %v1478_v27  ;;  %1401 = vmatprep.subr.bf16.mxu1 %v1478_v27 }
  0x50   : > { %1293 = vmatpush3.bf16.msra.mxu0 %v1479_v28  ;;  %1409 = vmatpush3.bf16.msra.mxu1 %v1479_v28 }
  0x51   : > { %1294 = vmatprep.subr.bf16.mxu0 %v1480_v29  ;;  %1402 = vmatprep.subr.bf16.mxu1 %v1480_v29  ;;  %v435_v29 = vld [vmem:[%s1668_s9 + $0x8] sm:$0xff] }
  0x54   : > { %1295 = vmatpush3.bf16.msra.mxu0 %v1481_v30  ;;  %1410 = vmatpush3.bf16.msra.mxu1 %v1481_v30 }
  0x55   : > { %1296 = vmatprep.subr.bf16.mxu0 %v1482_v31  ;;  %1403 = vmatprep.subr.bf16.mxu1 %v1482_v31  ;;  %v451_v31 = vld [vmem:[%s1668_s9 + $0x88] sm:$0xff] }
  0x58   : > { %1297 = vmatpush3.bf16.msra.mxu0 %v1483_v32  ;;  %1411 = vmatpush3.bf16.msra.mxu1 %v1483_v32 }
  0x59   : > { %1298 = vmatprep.subr.bf16.mxu0 %v1484_v33  ;;  %1404 = vmatprep.subr.bf16.mxu1 %v1484_v33 }
  0x5c   : > { %1299 = vmatpush3.bf16.msra.mxu0 %v1485_v34  ;;  %1412 = vmatpush3.bf16.msra.mxu1 %v1485_v34 }
  0x5d   : > { %1300 = vmatprep.subr.bf16.mxu0 %v1486_v35  ;;  %1405 = vmatprep.subr.bf16.mxu1 %v1486_v35 }
  0x60   : > { %1301 = vmatpush3.bf16.msra.mxu0 %v1487_v36  ;;  %1413 = vmatpush3.bf16.msra.mxu1 %v1487_v36 }
  0x63   : > { %595 = vmatmul.mubr.bf16.vlgmr.msra.gmra.mxu0 %v365_v39  ;;  %659 = vmatmul.mubr.bf16.vlgmr.msra.gmra.mxu1 %v381_v40  ;;  %v436_v39 = vld [vmem:[%s1668_s9 + $0x10] sm:$0xff] }
  0x64   : > { %602 = vmatprep.mubr.bf16.mxu0 %v368_v41  ;;  %666 = vmatprep.mubr.bf16.mxu1 %v384_v42  ;;  %v452_v41 = vld [vmem:[%s1668_s9 + $0x90] sm:$0xff] }
  0x6b   : > { %603 = vmatmul.mubr.bf16.gmra.mxu0 %v367_v45  ;;  %667 = vmatmul.mubr.bf16.gmra.mxu1 %v383_v46 }
  0x6c   : > { %610 = vmatprep.mubr.bf16.mxu0 %v370_v47  ;;  %674 = vmatprep.mubr.bf16.mxu1 %v386_v48 }
  0x73   : > { %611 = vmatmul.mubr.bf16.gmra.mxu0 %v369_v51  ;;  %675 = vmatmul.mubr.bf16.gmra.mxu1 %v385_v52  ;;  %v453_v51 = vld [vmem:[%s1668_s9 + $0x98] sm:$0xff] }
  0x74   : > { %618 = vmatprep.mubr.bf16.mxu0 %v372_v53  ;;  %682 = vmatprep.mubr.bf16.mxu1 %v388_v54 }
  0x7b   : > { %619 = vmatmul.mubr.bf16.gmra.mxu0 %v371_v57  ;;  %683 = vmatmul.mubr.bf16.gmra.mxu1 %v387_v58 }
  0x7c   : > { %626 = vmatprep.mubr.bf16.mxu0 %v374_v59  ;;  %690 = vmatprep.mubr.bf16.mxu1 %v390_v60  ;;  %v438_v59 = vld [vmem:[%s1668_s9 + $0x20] sm:$0xff] }
  0x83   : > { %627 = vmatmul.mubr.bf16.gmra.mxu0 %v373_v63  ;;  %691 = vmatmul.mubr.bf16.gmra.mxu1 %v389_v0 }
  0x84   : > { %634 = vmatprep.mubr.bf16.mxu0 %v376_v1  ;;  %698 = vmatprep.mubr.bf16.mxu1 %v392_v2 }
  0x8b   : > { %635 = vmatmul.mubr.bf16.gmra.mxu0 %v375_v5  ;;  %699 = vmatmul.mubr.bf16.gmra.mxu1 %v391_v6  ;;  %v439_v5 = vld [vmem:[%s1668_s9 + $0x28] sm:$0xff] }
  0x8c   : > { %642 = vmatprep.mubr.bf16.mxu0 %v378_v7  ;;  %706 = vmatprep.mubr.bf16.mxu1 %v394_v8  ;;  %v455_v7 = vld [vmem:[%s1668_s9 + $0xa8] sm:$0xff] }
  0x93   : > { %643 = vmatmul.mubr.bf16.gmra.mxu0 %v377_v11  ;;  %707 = vmatmul.mubr.bf16.gmra.mxu1 %v393_v12 }
  0x94   : > { %650 = vmatprep.mubr.bf16.mxu0 %v380_v13  ;;  %714 = vmatprep.mubr.bf16.mxu1 %v396_v14 }
  0x9b   : > { %651 = vmatmul.mubr.bf16.gmra.mxu0 %v379_v15  ;;  %715 = vmatmul.mubr.bf16.gmra.mxu1 %v395_v16  ;;  %v440_v15 = vld [vmem:[%s1668_s9 + $0x30] sm:$0xff] }
 0x123   : > { %v1302_v17 = vpop.f32.mrf.mxu0  ;;  %v1350_v18 = vpop.f32.mrf.mxu1 }
 0x125   : > { %v1303_v20 = vpop.f32.mrf.mxu0  ;;  %v1351_v22 = vpop.f32.mrf.mxu1 }
 0x126   : > { %v1304_v23 = vadd.f32 %v1303_v20, %v1302_v17  ;;  %v1352_v24 = vadd.f32 %v1351_v22, %v1350_v18  ;;  %v456_v17 = vld [vmem:[%s1668_s9 + $0xb0] sm:$0xff] }
 0x127   : > { %v1305_v25 = vpop.f32.mrf.mxu0  ;;  %v1353_v26 = vpop.f32.mrf.mxu1 }
 0x128   : > { %v723_v27 = vadd.f32 %v1304_v23, %v434_v19  ;;  %v739_v28 = vadd.f32 %v1352_v24, %v450_v21 }
 0x129   : > { %v1306_v30 = vpop.f32.mrf.mxu0  ;;  %v1354_v32 = vpop.f32.mrf.mxu1 }
 0x12a   : > { %755 = vst [vmem:[%s1668_s9] sm:$0xff] %v723_v27  ;;  %771 = vst [vmem:[%s1668_s9 + $0x80] sm:$0xff] %v739_v28  ;;  %v1307_v33 = vadd.f32 %v1306_v30, %v1305_v25  ;;  %v1355_v34 = vadd.f32 %v1354_v32, %v1353_v26  ;;  %v441_v25 = vld [vmem:[%s1668_s9 + $0x38] sm:$0xff] }
 0x12b   : > { %v1308_v35 = vpop.f32.mrf.mxu0  ;;  %v1356_v36 = vpop.f32.mrf.mxu1  ;;  %v457_v27 = vld [vmem:[%s1668_s9 + $0xb8] sm:$0xff] }
 0x12c   : > { %v724_v37 = vadd.f32 %v1307_v33, %v435_v29  ;;  %v740_v38 = vadd.f32 %v1355_v34, %v451_v31 }
 0x12d   : > { %v1309_v40 = vpop.f32.mrf.mxu0  ;;  %v1357_v42 = vpop.f32.mrf.mxu1 }
 0x12e   : > { %756 = vst [vmem:[%s1668_s9 + $0x8] sm:$0xff] %v724_v37  ;;  %772 = vst [vmem:[%s1668_s9 + $0x88] sm:$0xff] %v740_v38  ;;  %v1310_v43 = vadd.f32 %v1309_v40, %v1308_v35  ;;  %v1358_v44 = vadd.f32 %v1357_v42, %v1356_v36  ;;  %v442_v35 = vld [vmem:[%s1668_s9 + $0x40] sm:$0xff] }
 0x12f   : > { %v1311_v45 = vpop.f32.mrf.mxu0  ;;  %v1359_v46 = vpop.f32.mrf.mxu1  ;;  %v458_v37 = vld [vmem:[%s1668_s9 + $0xc0] sm:$0xff] }
 0x130   : > { %v725_v47 = vadd.f32 %v1310_v43, %v436_v39  ;;  %v741_v48 = vadd.f32 %v1358_v44, %v452_v41 }
 0x131   : > { %v1312_v50 = vpop.f32.mrf.mxu0  ;;  %v1360_v52 = vpop.f32.mrf.mxu1 }
 0x132   : > { %757 = vst [vmem:[%s1668_s9 + $0x10] sm:$0xff] %v725_v47  ;;  %773 = vst [vmem:[%s1668_s9 + $0x90] sm:$0xff] %v741_v48  ;;  %v1313_v53 = vadd.f32 %v1312_v50, %v1311_v45  ;;  %v1361_v54 = vadd.f32 %v1360_v52, %v1359_v46  ;;  %v443_v45 = vld [vmem:[%s1668_s9 + $0x48] sm:$0xff] }
 0x133   : > { %v1314_v55 = vpop.f32.mrf.mxu0  ;;  %v1362_v56 = vpop.f32.mrf.mxu1  ;;  %v459_v47 = vld [vmem:[%s1668_s9 + $0xc8] sm:$0xff] }
 0x134   : > { %v726_v57 = vadd.f32 %v1313_v53, %v437_v49  ;;  %v742_v58 = vadd.f32 %v1361_v54, %v453_v51 }
 0x135   : > { %v1315_v60 = vpop.f32.mrf.mxu0  ;;  %v1363_v62 = vpop.f32.mrf.mxu1 }
 0x136   : > { %758 = vst [vmem:[%s1668_s9 + $0x18] sm:$0xff] %v726_v57  ;;  %774 = vst [vmem:[%s1668_s9 + $0x98] sm:$0xff] %v742_v58  ;;  %v1316_v63 = vadd.f32 %v1315_v60, %v1314_v55  ;;  %v1364_v0 = vadd.f32 %v1363_v62, %v1362_v56  ;;  %v444_v55 = vld [vmem:[%s1668_s9 + $0x50] sm:$0xff] }
 0x137   : > { %v1317_v1 = vpop.f32.mrf.mxu0  ;;  %v1365_v2 = vpop.f32.mrf.mxu1  ;;  %v460_v57 = vld [vmem:[%s1668_s9 + $0xd0] sm:$0xff] }
 0x138   : > { %v727_v3 = vadd.f32 %v1316_v63, %v438_v59  ;;  %v743_v4 = vadd.f32 %v1364_v0, %v454_v61 }
 0x139   : > { %v1318_v6 = vpop.f32.mrf.mxu0  ;;  %v1366_v8 = vpop.f32.mrf.mxu1 }
 0x13a   : > { %759 = vst [vmem:[%s1668_s9 + $0x20] sm:$0xff] %v727_v3  ;;  %775 = vst [vmem:[%s1668_s9 + $0xa0] sm:$0xff] %v743_v4  ;;  %v1319_v9 = vadd.f32 %v1318_v6, %v1317_v1  ;;  %v1367_v10 = vadd.f32 %v1366_v8, %v1365_v2  ;;  %v445_v1 = vld [vmem:[%s1668_s9 + $0x58] sm:$0xff] }
 0x13b   : > { %v1320_v11 = vpop.f32.mrf.mxu0  ;;  %v1368_v12 = vpop.f32.mrf.mxu1  ;;  %v461_v3 = vld [vmem:[%s1668_s9 + $0xd8] sm:$0xff] }
 0x13c   : > { %v728_v13 = vadd.f32 %v1319_v9, %v439_v5  ;;  %v744_v14 = vadd.f32 %v1367_v10, %v455_v7 }
 0x13d   : > { %v1321_v16 = vpop.f32.mrf.mxu0  ;;  %v1369_v18 = vpop.f32.mrf.mxu1 }
 0x13e   : > { %760 = vst [vmem:[%s1668_s9 + $0x28] sm:$0xff] %v728_v13  ;;  %776 = vst [vmem:[%s1668_s9 + $0xa8] sm:$0xff] %v744_v14  ;;  %v1322_v19 = vadd.f32 %v1321_v16, %v1320_v11  ;;  %v1370_v20 = vadd.f32 %v1369_v18, %v1368_v12  ;;  %v446_v11 = vld [vmem:[%s1668_s9 + $0x60] sm:$0xff] }
 0x13f   : > { %v1323_v21 = vpop.f32.mrf.mxu0  ;;  %v1371_v22 = vpop.f32.mrf.mxu1  ;;  %v462_v13 = vld [vmem:[%s1668_s9 + $0xe0] sm:$0xff] }
 0x140   : > { %v729_v23 = vadd.f32 %v1322_v19, %v440_v15  ;;  %v745_v24 = vadd.f32 %v1370_v20, %v456_v17 }
 0x141   : > { %v1324_v26 = vpop.f32.mrf.mxu0  ;;  %v1372_v28 = vpop.f32.mrf.mxu1 }
 0x142   : > { %761 = vst [vmem:[%s1668_s9 + $0x30] sm:$0xff] %v729_v23  ;;  %777 = vst [vmem:[%s1668_s9 + $0xb0] sm:$0xff] %v745_v24  ;;  %v1325_v29 = vadd.f32 %v1324_v26, %v1323_v21  ;;  %v1373_v30 = vadd.f32 %v1372_v28, %v1371_v22  ;;  %v447_v21 = vld [vmem:[%s1668_s9 + $0x68] sm:$0xff] }
 0x143   : > { %v1326_v31 = vpop.f32.mrf.mxu0  ;;  %v1374_v32 = vpop.f32.mrf.mxu1  ;;  %v463_v23 = vld [vmem:[%s1668_s9 + $0xe8] sm:$0xff] }
 0x144   : > { %v730_v33 = vadd.f32 %v1325_v29, %v441_v25  ;;  %v746_v34 = vadd.f32 %v1373_v30, %v457_v27 }
 0x145   : > { %v1327_v36 = vpop.f32.mrf.mxu0  ;;  %v1375_v38 = vpop.f32.mrf.mxu1 }
 0x146   : > { %762 = vst [vmem:[%s1668_s9 + $0x38] sm:$0xff] %v730_v33  ;;  %778 = vst [vmem:[%s1668_s9 + $0xb8] sm:$0xff] %v746_v34  ;;  %v1328_v39 = vadd.f32 %v1327_v36, %v1326_v31  ;;  %v1376_v40 = vadd.f32 %v1375_v38, %v1374_v32  ;;  %v448_v31 = vld [vmem:[%s1668_s9 + $0x70] sm:$0xff] }
 0x147   : > { %v1329_v41 = vpop.f32.mrf.mxu0  ;;  %v1377_v42 = vpop.f32.mrf.mxu1  ;;  %v464_v33 = vld [vmem:[%s1668_s9 + $0xf0] sm:$0xff] }
 0x148   : > { %v731_v43 = vadd.f32 %v1328_v39, %v442_v35  ;;  %v747_v44 = vadd.f32 %v1376_v40, %v458_v37 }
 0x149   : > { %v1330_v46 = vpop.f32.mrf.mxu0  ;;  %v1378_v48 = vpop.f32.mrf.mxu1 }
 0x14a   : > { %763 = vst [vmem:[%s1668_s9 + $0x40] sm:$0xff] %v731_v43  ;;  %779 = vst [vmem:[%s1668_s9 + $0xc0] sm:$0xff] %v747_v44  ;;  %v1331_v49 = vadd.f32 %v1330_v46, %v1329_v41  ;;  %v1379_v50 = vadd.f32 %v1378_v48, %v1377_v42  ;;  %v449_v41 = vld [vmem:[%s1668_s9 + $0x78] sm:$0xff] }
 0x14b   : > { %v1332_v51 = vpop.f32.mrf.mxu0  ;;  %v1380_v52 = vpop.f32.mrf.mxu1  ;;  %v465_v43 = vld [vmem:[%s1668_s9 + $0xf8] sm:$0xff] }
 0x14c   : > { %v732_v53 = vadd.f32 %v1331_v49, %v443_v45  ;;  %v748_v54 = vadd.f32 %v1379_v50, %v459_v47 }
 0x14d   : > { %v1333_v56 = vpop.f32.mrf.mxu0  ;;  %v1381_v58 = vpop.f32.mrf.mxu1 }
 0x14e   : > { %764 = vst [vmem:[%s1668_s9 + $0x48] sm:$0xff] %v732_v53  ;;  %780 = vst [vmem:[%s1668_s9 + $0xc8] sm:$0xff] %v748_v54  ;;  %v1334_v59 = vadd.f32 %v1333_v56, %v1332_v51  ;;  %v1382_v60 = vadd.f32 %v1381_v58, %v1380_v52 }
 0x14f   : > { %v1335_v61 = vpop.f32.mrf.mxu0  ;;  %v1383_v62 = vpop.f32.mrf.mxu1 }
 0x150   : > { %v733_v63 = vadd.f32 %v1334_v59, %v444_v55  ;;  %v749_v0 = vadd.f32 %v1382_v60, %v460_v57 }
 0x151   : > { %v1336_v2 = vpop.f32.mrf.mxu0  ;;  %v1384_v4 = vpop.f32.mrf.mxu1 }
 0x152   : > { %765 = vst [vmem:[%s1668_s9 + $0x50] sm:$0xff] %v733_v63  ;;  %781 = vst [vmem:[%s1668_s9 + $0xd0] sm:$0xff] %v749_v0  ;;  %v1337_v5 = vadd.f32 %v1336_v2, %v1335_v61  ;;  %v1385_v6 = vadd.f32 %v1384_v4, %v1383_v62 }
 0x153   : > { %v1338_v7 = vpop.f32.mrf.mxu0  ;;  %v1386_v8 = vpop.f32.mrf.mxu1 }
 0x154   : > { %v734_v9 = vadd.f32 %v1337_v5, %v445_v1  ;;  %v750_v10 = vadd.f32 %v1385_v6, %v461_v3 }
 0x155   : > { %v1339_v12 = vpop.f32.mrf.mxu0  ;;  %v1387_v14 = vpop.f32.mrf.mxu1 }
 0x156   : > { %766 = vst [vmem:[%s1668_s9 + $0x58] sm:$0xff] %v734_v9  ;;  %782 = vst [vmem:[%s1668_s9 + $0xd8] sm:$0xff] %v750_v10  ;;  %v1340_v15 = vadd.f32 %v1339_v12, %v1338_v7  ;;  %v1388_v16 = vadd.f32 %v1387_v14, %v1386_v8 }
 0x157   : > { %v1341_v17 = vpop.f32.mrf.mxu0  ;;  %v1389_v18 = vpop.f32.mrf.mxu1 }
 0x158   : > { %v735_v19 = vadd.f32 %v1340_v15, %v446_v11  ;;  %v751_v20 = vadd.f32 %v1388_v16, %v462_v13 }
 0x159   : > { %v1342_v22 = vpop.f32.mrf.mxu0  ;;  %v1390_v24 = vpop.f32.mrf.mxu1 }
 0x15a   : > { %767 = vst [vmem:[%s1668_s9 + $0x60] sm:$0xff] %v735_v19  ;;  %783 = vst [vmem:[%s1668_s9 + $0xe0] sm:$0xff] %v751_v20  ;;  %v1343_v25 = vadd.f32 %v1342_v22, %v1341_v17  ;;  %v1391_v26 = vadd.f32 %v1390_v24, %v1389_v18 }
 0x15b   : > { %v1344_v27 = vpop.f32.mrf.mxu0  ;;  %v1392_v28 = vpop.f32.mrf.mxu1 }
 0x15c   : > { %v736_v29 = vadd.f32 %v1343_v25, %v447_v21  ;;  %v752_v30 = vadd.f32 %v1391_v26, %v463_v23 }
 0x15d   : > { %v1345_v32 = vpop.f32.mrf.mxu0  ;;  %v1393_v34 = vpop.f32.mrf.mxu1 }
 0x15e   : > { %768 = vst [vmem:[%s1668_s9 + $0x68] sm:$0xff] %v736_v29  ;;  %784 = vst [vmem:[%s1668_s9 + $0xe8] sm:$0xff] %v752_v30  ;;  %v1346_v35 = vadd.f32 %v1345_v32, %v1344_v27  ;;  %v1394_v36 = vadd.f32 %v1393_v34, %v1392_v28 }
 0x15f   : > { %v1347_v37 = vpop.f32.mrf.mxu0  ;;  %v1395_v38 = vpop.f32.mrf.mxu1 }
 0x160   : > { %v737_v39 = vadd.f32 %v1346_v35, %v448_v31  ;;  %v753_v40 = vadd.f32 %v1394_v36, %v464_v33 }
 0x161   : > { %v1348_v42 = vpop.f32.mrf.mxu0  ;;  %v1396_v44 = vpop.f32.mrf.mxu1 }
 0x162   : > { %769 = vst [vmem:[%s1668_s9 + $0x70] sm:$0xff] %v737_v39  ;;  %785 = vst [vmem:[%s1668_s9 + $0xf0] sm:$0xff] %v753_v40  ;;  %v1349_v45 = vadd.f32 %v1348_v42, %v1347_v37  ;;  %v1397_v46 = vadd.f32 %v1396_v44, %v1395_v38  ;;  %790 = sbr.rel (%p1282_p12) target bundleno = 550 (0x226), region = 67 }
 0x164   : > { %v738_v47 = vadd.f32 %v1349_v45, %v449_v41  ;;  %v754_v48 = vadd.f32 %v1397_v46, %v465_v43 }
 0x166   : > { %770 = vst [vmem:[%s1668_s9 + $0x78] sm:$0xff] %v738_v47  ;;  %786 = vst [vmem:[%s1668_s9 + $0xf8] sm:$0xff] %v754_v48 }
 0x167   : > { %v793_v49 = vld [vmem:[%s1658_s29 + $0x10] sm:$0xff]  ;;  %v791_v50 = vld [vmem:[%s1658_s29] sm:$0xff]  ;;  %v1547_v51 = vmov 0   ;;  %v794_v52 = vld [vmem:[%s1658_s29 + $0x18] sm:$0xff] }
 0x168   : > { %1489 = vset.pattern.permute.xlu1 %v1547_v51  ;;  %1488 = vset.pattern.permute.xlu0 %v1547_v51  ;;  %v792_v53 = vld [vmem:[%s1658_s29 + $0x8] sm:$0xff]  ;;  %v795_v55 = vld [vmem:[%s1658_s29 + $0x20] sm:$0xff]  ;;  %v798_v56 = vld [vmem:[%s1658_s29 + $0x38] sm:$0xff] }
 0x169   : > { %867 = vperm.xlu1 %1489, %v793_v49   ;;  %857 = vperm.xlu0 %1488, %v791_v50   ;;  %v796_v54 = vld [vmem:[%s1658_s29 + $0x28] sm:$0xff]  ;;  %v797_v57 = vld [vmem:[%s1658_s29 + $0x30] sm:$0xff]  ;;  %v799_v59 = vld [vmem:[%s1658_s29 + $0x40] sm:$0xff] }
 0x16a   : > { %v800_v58 = vld [vmem:[%s1658_s29 + $0x48] sm:$0xff]  ;;  %v802_v60 = vld [vmem:[%s1658_s29 + $0x58] sm:$0xff]  ;;  %v801_v61 = vld [vmem:[%s1658_s29 + $0x50] sm:$0xff] }
 0x16b   : > { %v804_v62 = vld [vmem:[%s1658_s29 + $0x68] sm:$0xff]  ;;  %v803_v63 = vld [vmem:[%s1658_s29 + $0x60] sm:$0xff]  ;;  %v806_v0 = vld [vmem:[%s1658_s29 + $0x78] sm:$0xff] }
 0x16c   : > { %v805_v1 = vld [vmem:[%s1658_s29 + $0x70] sm:$0xff]  ;;  %v808_v2 = vld [vmem:[%s1658_s29 + $0x88] sm:$0xff]  ;;  %v807_v3 = vld [vmem:[%s1658_s29 + $0x80] sm:$0xff] }
 0x16d   : > { %872 = vperm.xlu1 %1489, %v794_v52   ;;  %862 = vperm.xlu0 %1488, %v792_v53   ;;  %v810_v4 = vld [vmem:[%s1658_s29 + $0x98] sm:$0xff]  ;;  %v809_v5 = vld [vmem:[%s1658_s29 + $0x90] sm:$0xff]  ;;  %v812_v6 = vld [vmem:[%s1658_s29 + $0xa8] sm:$0xff] }
 0x16e   : > { %v811_v7 = vld [vmem:[%s1658_s29 + $0xa0] sm:$0xff]  ;;  %v814_v8 = vld [vmem:[%s1658_s29 + $0xb8] sm:$0xff]  ;;  %v813_v9 = vld [vmem:[%s1658_s29 + $0xb0] sm:$0xff] }
 0x16f   : > { %v816_v10 = vld [vmem:[%s1658_s29 + $0xc8] sm:$0xff]  ;;  %v815_v11 = vld [vmem:[%s1658_s29 + $0xc0] sm:$0xff]  ;;  %v818_v12 = vld [vmem:[%s1658_s29 + $0xd8] sm:$0xff] }
 0x170   : > { %v817_v13 = vld [vmem:[%s1658_s29 + $0xd0] sm:$0xff]  ;;  %v820_v14 = vld [vmem:[%s1658_s29 + $0xe8] sm:$0xff]  ;;  %v819_v15 = vld [vmem:[%s1658_s29 + $0xe0] sm:$0xff] }
 0x171   : > { %882 = vperm.xlu1 %1489, %v796_v54   ;;  %877 = vperm.xlu0 %1488, %v795_v55   ;;  %v822_v16 = vld [vmem:[%s1658_s29 + $0xf8] sm:$0xff]  ;;  %v821_v17 = vld [vmem:[%s1658_s29 + $0xf0] sm:$0xff]  ;;  %v823_v19 = vld [vmem:[%s1668_s9] sm:$0xff] }
 0x172   : > { %v825_v18 = vld [vmem:[%s1668_s9 + $0x10] sm:$0xff]  ;;  %v1047_v22 = vld [vmem:[%s1663_s6] sm:$0xff]  ;;  %v826_v26 = vld [vmem:[%s1668_s9 + $0x18] sm:$0xff] }
 0x173   : > { %v1049_v20 = vld [vmem:[%s1663_s6 + $0x10] sm:$0xff]  ;;  %v824_v27 = vld [vmem:[%s1668_s9 + $0x8] sm:$0xff]  ;;  %v1050_v30 = vld [vmem:[%s1663_s6 + $0x18] sm:$0xff] }
 0x174   : > { %v1048_v32 = vld [vmem:[%s1663_s6 + $0x8] sm:$0xff]  ;;  %v827_v37 = vld [vmem:[%s1668_s9 + $0x20] sm:$0xff]  ;;  %v830_v46 = vld [vmem:[%s1668_s9 + $0x38] sm:$0xff] }
 0x175   : > { %892 = vperm.xlu1 %1489, %v798_v56   ;;  %887 = vperm.xlu0 %1488, %v797_v57   ;;  %v828_v36 = vld [vmem:[%s1668_s9 + $0x28] sm:$0xff]  ;;  %v1051_v42 = vld [vmem:[%s1663_s6 + $0x20] sm:$0xff]  ;;  %v829_v47 = vld [vmem:[%s1668_s9 + $0x30] sm:$0xff] }
 0x176   : > { %v1052_v40 = vld [vmem:[%s1663_s6 + $0x28] sm:$0xff]  ;;  %v1054_v50 = vld [vmem:[%s1663_s6 + $0x38] sm:$0xff]  ;;  %v1053_v52 = vld [vmem:[%s1663_s6 + $0x30] sm:$0xff] }
 0x177   : > { %v832_v56 = vld [vmem:[%s1668_s9 + $0x48] sm:$0xff]  ;;  %v831_v57 = vld [vmem:[%s1668_s9 + $0x40] sm:$0xff] }
 0x179   : > { %902 = vperm.xlu1 %1489, %v800_v58   ;;  %897 = vperm.xlu0 %1488, %v799_v59  }
 0x17d   : > { %912 = vperm.xlu1 %1489, %v802_v60   ;;  %907 = vperm.xlu0 %1488, %v801_v61   ;;  %v1056_v60 = vld [vmem:[%s1663_s6 + $0x48] sm:$0xff] }
 0x181   : > { %922 = vperm.xlu1 %1489, %v804_v62   ;;  %917 = vperm.xlu0 %1488, %v803_v63   ;;  %v1055_v62 = vld [vmem:[%s1663_s6 + $0x40] sm:$0xff] }
 0x185   : > { %932 = vperm.xlu1 %1489, %v806_v0   ;;  %927 = vperm.xlu0 %1488, %v805_v1  }
 0x189   : > { %942 = vperm.xlu1 %1489, %v808_v2   ;;  %937 = vperm.xlu0 %1488, %v807_v3   ;;  %v834_v2 = vld [vmem:[%s1668_s9 + $0x58] sm:$0xff]  ;;  %v833_v3 = vld [vmem:[%s1668_s9 + $0x50] sm:$0xff] }
 0x18d   : > { %952 = vperm.xlu1 %1489, %v810_v4   ;;  %947 = vperm.xlu0 %1488, %v809_v5  }
 0x191   : > { %962 = vperm.xlu1 %1489, %v812_v6   ;;  %957 = vperm.xlu0 %1488, %v811_v7   ;;  %v1058_v6 = vld [vmem:[%s1663_s6 + $0x58] sm:$0xff] }
 0x195   : > { %972 = vperm.xlu1 %1489, %v814_v8   ;;  %967 = vperm.xlu0 %1488, %v813_v9   ;;  %v1057_v8 = vld [vmem:[%s1663_s6 + $0x50] sm:$0xff] }
 0x199   : > { %982 = vperm.xlu1 %1489, %v816_v10   ;;  %977 = vperm.xlu0 %1488, %v815_v11  }
 0x19d   : > { %992 = vperm.xlu1 %1489, %v818_v12   ;;  %987 = vperm.xlu0 %1488, %v817_v13   ;;  %v836_v12 = vld [vmem:[%s1668_s9 + $0x68] sm:$0xff]  ;;  %v835_v13 = vld [vmem:[%s1668_s9 + $0x60] sm:$0xff] }
 0x1a1   : > { %1002 = vperm.xlu1 %1489, %v820_v14   ;;  %997 = vperm.xlu0 %1488, %v819_v15  }
 0x1a5   : > { %1012 = vperm.xlu1 %1489, %v822_v16   ;;  %1007 = vperm.xlu0 %1488, %v821_v17   ;;  %v1060_v16 = vld [vmem:[%s1663_s6 + $0x68] sm:$0xff] }
 0x1e4   : > { %v868_v21 = vpop.permute.xlu1 %867  ;;  %v858_v23 = vpop.permute.xlu0 %857 }
 0x1e5   : > { %v1017_v24 = vmul.f32 %v868_v21, %v825_v18  ;;  %v1015_v25 = vmul.f32 %v858_v23, %v823_v19  ;;  %v1059_v18 = vld [vmem:[%s1663_s6 + $0x60] sm:$0xff]  ;;  %v837_v23 = vld [vmem:[%s1668_s9 + $0x70] sm:$0xff] }
 0x1e7   : > { %v1081_v28 = vadd.f32 %v1049_v20, %v1017_v24  ;;  %v1079_v29 = vadd.f32 %v1047_v22, %v1015_v25  ;;  %v838_v22 = vld [vmem:[%s1668_s9 + $0x78] sm:$0xff] }
 0x1e8   : > { %v873_v31 = vpop.permute.xlu1 %872  ;;  %v863_v33 = vpop.permute.xlu0 %862 }
 0x1e9   : > { %1113 = vst [vmem:[%s1668_s9 + $0x10] sm:$0xff] %v1081_v28  ;;  %1111 = vst [vmem:[%s1668_s9] sm:$0xff] %v1079_v29  ;;  %v1018_v34 = vmul.f32 %v873_v31, %v826_v26  ;;  %v1016_v35 = vmul.f32 %v863_v33, %v824_v27  ;;  %v1062_v26 = vld [vmem:[%s1663_s6 + $0x78] sm:$0xff]  ;;  %v1061_v28 = vld [vmem:[%s1663_s6 + $0x70] sm:$0xff] }
 0x1ea   : > { %v839_v33 = vld [vmem:[%s1668_s9 + $0x80] sm:$0xff] }
 0x1eb   : > { %v1082_v38 = vadd.f32 %v1050_v30, %v1018_v34  ;;  %v1080_v39 = vadd.f32 %v1048_v32, %v1016_v35  ;;  %v840_v32 = vld [vmem:[%s1668_s9 + $0x88] sm:$0xff] }
 0x1ec   : > { %v883_v41 = vpop.permute.xlu1 %882  ;;  %v878_v43 = vpop.permute.xlu0 %877 }
 0x1ed   : > { %1114 = vst [vmem:[%s1668_s9 + $0x18] sm:$0xff] %v1082_v38  ;;  %1112 = vst [vmem:[%s1668_s9 + $0x8] sm:$0xff] %v1080_v39  ;;  %v1020_v44 = vmul.f32 %v883_v41, %v828_v36  ;;  %v1019_v45 = vmul.f32 %v878_v43, %v827_v37  ;;  %v1064_v36 = vld [vmem:[%s1663_s6 + $0x88] sm:$0xff]  ;;  %v1063_v38 = vld [vmem:[%s1663_s6 + $0x80] sm:$0xff] }
 0x1ee   : > { %v841_v43 = vld [vmem:[%s1668_s9 + $0x90] sm:$0xff] }
 0x1ef   : > { %v1084_v48 = vadd.f32 %v1052_v40, %v1020_v44  ;;  %v1083_v49 = vadd.f32 %v1051_v42, %v1019_v45  ;;  %v842_v42 = vld [vmem:[%s1668_s9 + $0x98] sm:$0xff] }
 0x1f0   : > { %v893_v51 = vpop.permute.xlu1 %892  ;;  %v888_v53 = vpop.permute.xlu0 %887 }
 0x1f1   : > { %1116 = vst [vmem:[%s1668_s9 + $0x28] sm:$0xff] %v1084_v48  ;;  %1115 = vst [vmem:[%s1668_s9 + $0x20] sm:$0xff] %v1083_v49  ;;  %v1022_v54 = vmul.f32 %v893_v51, %v830_v46  ;;  %v1021_v55 = vmul.f32 %v888_v53, %v829_v47  ;;  %v1066_v46 = vld [vmem:[%s1663_s6 + $0x98] sm:$0xff]  ;;  %v1065_v48 = vld [vmem:[%s1663_s6 + $0x90] sm:$0xff] }
 0x1f2   : > { %v843_v53 = vld [vmem:[%s1668_s9 + $0xa0] sm:$0xff] }
 0x1f3   : > { %v1086_v58 = vadd.f32 %v1054_v50, %v1022_v54  ;;  %v1085_v59 = vadd.f32 %v1053_v52, %v1021_v55  ;;  %v844_v52 = vld [vmem:[%s1668_s9 + $0xa8] sm:$0xff] }
 0x1f4   : > { %v903_v61 = vpop.permute.xlu1 %902  ;;  %v898_v63 = vpop.permute.xlu0 %897 }
 0x1f5   : > { %1118 = vst [vmem:[%s1668_s9 + $0x38] sm:$0xff] %v1086_v58  ;;  %1117 = vst [vmem:[%s1668_s9 + $0x30] sm:$0xff] %v1085_v59  ;;  %v1024_v0 = vmul.f32 %v903_v61, %v832_v56  ;;  %v1023_v1 = vmul.f32 %v898_v63, %v831_v57  ;;  %v1068_v56 = vld [vmem:[%s1663_s6 + $0xa8] sm:$0xff]  ;;  %v1067_v58 = vld [vmem:[%s1663_s6 + $0xa0] sm:$0xff] }
 0x1f6   : > { %v845_v63 = vld [vmem:[%s1668_s9 + $0xb0] sm:$0xff] }
 0x1f7   : > { %v1088_v4 = vadd.f32 %v1056_v60, %v1024_v0  ;;  %v1087_v5 = vadd.f32 %v1055_v62, %v1023_v1  ;;  %v846_v62 = vld [vmem:[%s1668_s9 + $0xb8] sm:$0xff] }
 0x1f8   : > { %v913_v7 = vpop.permute.xlu1 %912  ;;  %v908_v9 = vpop.permute.xlu0 %907 }
 0x1f9   : > { %1120 = vst [vmem:[%s1668_s9 + $0x48] sm:$0xff] %v1088_v4  ;;  %1119 = vst [vmem:[%s1668_s9 + $0x40] sm:$0xff] %v1087_v5  ;;  %v1026_v10 = vmul.f32 %v913_v7, %v834_v2  ;;  %v1025_v11 = vmul.f32 %v908_v9, %v833_v3  ;;  %v1070_v2 = vld [vmem:[%s1663_s6 + $0xb8] sm:$0xff]  ;;  %v1069_v4 = vld [vmem:[%s1663_s6 + $0xb0] sm:$0xff] }
 0x1fa   : > { %v847_v9 = vld [vmem:[%s1668_s9 + $0xc0] sm:$0xff] }
 0x1fb   : > { %v1090_v14 = vadd.f32 %v1058_v6, %v1026_v10  ;;  %v1089_v15 = vadd.f32 %v1057_v8, %v1025_v11  ;;  %v848_v8 = vld [vmem:[%s1668_s9 + $0xc8] sm:$0xff] }
 0x1fc   : > { %v923_v17 = vpop.permute.xlu1 %922  ;;  %v918_v19 = vpop.permute.xlu0 %917 }
 0x1fd   : > { %1122 = vst [vmem:[%s1668_s9 + $0x58] sm:$0xff] %v1090_v14  ;;  %1121 = vst [vmem:[%s1668_s9 + $0x50] sm:$0xff] %v1089_v15  ;;  %v1028_v20 = vmul.f32 %v923_v17, %v836_v12  ;;  %v1027_v21 = vmul.f32 %v918_v19, %v835_v13  ;;  %v1072_v12 = vld [vmem:[%s1663_s6 + $0xc8] sm:$0xff]  ;;  %v1071_v14 = vld [vmem:[%s1663_s6 + $0xc0] sm:$0xff] }
 0x1fe   : > { %v849_v19 = vld [vmem:[%s1668_s9 + $0xd0] sm:$0xff] }
 0x1ff   : > { %v1092_v24 = vadd.f32 %v1060_v16, %v1028_v20  ;;  %v1091_v25 = vadd.f32 %v1059_v18, %v1027_v21  ;;  %v850_v18 = vld [vmem:[%s1668_s9 + $0xd8] sm:$0xff] }
 0x200   : > { %v933_v27 = vpop.permute.xlu1 %932  ;;  %v928_v29 = vpop.permute.xlu0 %927 }
 0x201   : > { %1124 = vst [vmem:[%s1668_s9 + $0x68] sm:$0xff] %v1092_v24  ;;  %1123 = vst [vmem:[%s1668_s9 + $0x60] sm:$0xff] %v1091_v25  ;;  %v1030_v30 = vmul.f32 %v933_v27, %v838_v22  ;;  %v1029_v31 = vmul.f32 %v928_v29, %v837_v23  ;;  %v1074_v22 = vld [vmem:[%s1663_s6 + $0xd8] sm:$0xff]  ;;  %v1073_v24 = vld [vmem:[%s1663_s6 + $0xd0] sm:$0xff] }
 0x202   : > { %v851_v29 = vld [vmem:[%s1668_s9 + $0xe0] sm:$0xff] }
 0x203   : > { %v1094_v34 = vadd.f32 %v1062_v26, %v1030_v30  ;;  %v1093_v35 = vadd.f32 %v1061_v28, %v1029_v31  ;;  %v852_v28 = vld [vmem:[%s1668_s9 + $0xe8] sm:$0xff] }
 0x204   : > { %v943_v37 = vpop.permute.xlu1 %942  ;;  %v938_v39 = vpop.permute.xlu0 %937 }
 0x205   : > { %1126 = vst [vmem:[%s1668_s9 + $0x78] sm:$0xff] %v1094_v34  ;;  %1125 = vst [vmem:[%s1668_s9 + $0x70] sm:$0xff] %v1093_v35  ;;  %v1032_v40 = vmul.f32 %v943_v37, %v840_v32  ;;  %v1031_v41 = vmul.f32 %v938_v39, %v839_v33  ;;  %v1076_v32 = vld [vmem:[%s1663_s6 + $0xe8] sm:$0xff]  ;;  %v1075_v34 = vld [vmem:[%s1663_s6 + $0xe0] sm:$0xff] }
 0x206   : > { %v853_v39 = vld [vmem:[%s1668_s9 + $0xf0] sm:$0xff] }
 0x207   : > { %v1096_v44 = vadd.f32 %v1064_v36, %v1032_v40  ;;  %v1095_v45 = vadd.f32 %v1063_v38, %v1031_v41  ;;  %v854_v38 = vld [vmem:[%s1668_s9 + $0xf8] sm:$0xff] }
 0x208   : > { %v953_v47 = vpop.permute.xlu1 %952  ;;  %v948_v49 = vpop.permute.xlu0 %947 }
 0x209   : > { %1128 = vst [vmem:[%s1668_s9 + $0x88] sm:$0xff] %v1096_v44  ;;  %1127 = vst [vmem:[%s1668_s9 + $0x80] sm:$0xff] %v1095_v45  ;;  %v1034_v50 = vmul.f32 %v953_v47, %v842_v42  ;;  %v1033_v51 = vmul.f32 %v948_v49, %v841_v43  ;;  %v1078_v42 = vld [vmem:[%s1663_s6 + $0xf8] sm:$0xff]  ;;  %v1077_v44 = vld [vmem:[%s1663_s6 + $0xf0] sm:$0xff] }
 0x20b   : > { %v1098_v54 = vadd.f32 %v1066_v46, %v1034_v50  ;;  %v1097_v55 = vadd.f32 %v1065_v48, %v1033_v51 }
 0x20c   : > { %v963_v57 = vpop.permute.xlu1 %962  ;;  %v958_v59 = vpop.permute.xlu0 %957 }
 0x20d   : > { %1130 = vst [vmem:[%s1668_s9 + $0x98] sm:$0xff] %v1098_v54  ;;  %1129 = vst [vmem:[%s1668_s9 + $0x90] sm:$0xff] %v1097_v55  ;;  %v1036_v60 = vmul.f32 %v963_v57, %v844_v52  ;;  %v1035_v61 = vmul.f32 %v958_v59, %v843_v53 }
 0x20f   : > { %v1100_v0 = vadd.f32 %v1068_v56, %v1036_v60  ;;  %v1099_v1 = vadd.f32 %v1067_v58, %v1035_v61 }
 0x210   : > { %v973_v3 = vpop.permute.xlu1 %972  ;;  %v968_v5 = vpop.permute.xlu0 %967 }
 0x211   : > { %1132 = vst [vmem:[%s1668_s9 + $0xa8] sm:$0xff] %v1100_v0  ;;  %1131 = vst [vmem:[%s1668_s9 + $0xa0] sm:$0xff] %v1099_v1  ;;  %v1038_v6 = vmul.f32 %v973_v3, %v846_v62  ;;  %v1037_v7 = vmul.f32 %v968_v5, %v845_v63 }
 0x213   : > { %v1102_v10 = vadd.f32 %v1070_v2, %v1038_v6  ;;  %v1101_v11 = vadd.f32 %v1069_v4, %v1037_v7 }
 0x214   : > { %v983_v13 = vpop.permute.xlu1 %982  ;;  %v978_v15 = vpop.permute.xlu0 %977 }
 0x215   : > { %1134 = vst [vmem:[%s1668_s9 + $0xb8] sm:$0xff] %v1102_v10  ;;  %1133 = vst [vmem:[%s1668_s9 + $0xb0] sm:$0xff] %v1101_v11  ;;  %v1040_v16 = vmul.f32 %v983_v13, %v848_v8  ;;  %v1039_v17 = vmul.f32 %v978_v15, %v847_v9 }
 0x217   : > { %v1104_v20 = vadd.f32 %v1072_v12, %v1040_v16  ;;  %v1103_v21 = vadd.f32 %v1071_v14, %v1039_v17 }
 0x218   : > { %v993_v23 = vpop.permute.xlu1 %992  ;;  %v988_v25 = vpop.permute.xlu0 %987 }
 0x219   : > { %1136 = vst [vmem:[%s1668_s9 + $0xc8] sm:$0xff] %v1104_v20  ;;  %1135 = vst [vmem:[%s1668_s9 + $0xc0] sm:$0xff] %v1103_v21  ;;  %v1042_v26 = vmul.f32 %v993_v23, %v850_v18  ;;  %v1041_v27 = vmul.f32 %v988_v25, %v849_v19 }
 0x21b   : > { %v1106_v30 = vadd.f32 %v1074_v22, %v1042_v26  ;;  %v1105_v31 = vadd.f32 %v1073_v24, %v1041_v27 }
 0x21c   : > { %v1003_v33 = vpop.permute.xlu1 %1002  ;;  %v998_v35 = vpop.permute.xlu0 %997 }
 0x21d   : > { %1138 = vst [vmem:[%s1668_s9 + $0xd8] sm:$0xff] %v1106_v30  ;;  %1137 = vst [vmem:[%s1668_s9 + $0xd0] sm:$0xff] %v1105_v31  ;;  %v1044_v36 = vmul.f32 %v1003_v33, %v852_v28  ;;  %v1043_v37 = vmul.f32 %v998_v35, %v851_v29 }
 0x21f   : > { %v1108_v40 = vadd.f32 %v1076_v32, %v1044_v36  ;;  %v1107_v41 = vadd.f32 %v1075_v34, %v1043_v37 }
 0x220   : > { %v1013_v43 = vpop.permute.xlu1 %1012  ;;  %v1008_v45 = vpop.permute.xlu0 %1007 }
 0x221   : > { %1140 = vst [vmem:[%s1668_s9 + $0xe8] sm:$0xff] %v1108_v40  ;;  %1139 = vst [vmem:[%s1668_s9 + $0xe0] sm:$0xff] %v1107_v41  ;;  %v1046_v46 = vmul.f32 %v1013_v43, %v854_v38  ;;  %v1045_v47 = vmul.f32 %v1008_v45, %v853_v39 }
 0x223   : > { %v1110_v48 = vadd.f32 %v1078_v42, %v1046_v46  ;;  %v1109_v49 = vadd.f32 %v1077_v44, %v1045_v47 }
 0x225   : > { %1142 = vst [vmem:[%s1668_s9 + $0xf8] sm:$0xff] %v1110_v48  ;;  %1141 = vst [vmem:[%s1668_s9 + $0xf0] sm:$0xff] %v1109_v49 }
 0x226 PF: > { %s14_s21 = sadd.s32 1, %s1544_s21   ;;  %s1970_s15 = smov %s1524_s16 }
 0x227   : > { %p11_p13 = scmp.ge.s32.totalorder %s14_s21, 6   ;;  %s1971_s16 = smov %s1624_s28 }
 0x228   : > { %s1972_s17 = smov %s1536_s19  ;;  %s1973_s18 = smov %s1540_s20 }
 0x229   : > { %s1974_s19 = smov %s1977_s22  ;;  %s1975_s20 = smov %s1981_s23 }
 0x22a   :  { %13 = sbr.rel (!%p11_p13) target bundleno = 4 (0x4), region = 109 }

</bundles_post_ra>
